<compile_context>
chip_gen: v5e
topology: v5e:2x2
jax: 0.10.0
libtpu: 0.0.40
codegen_flags: <defaults>
</compile_context>

<pallas_src>
import jax
import jax.numpy as jnp
from jax.experimental import pallas as pl
from jax.experimental.pallas import tpu as pltpu


# ---------------------------------------------------------------------------
# Pallas kernel: one grid step processes a chunk of TT time steps.
# Gate order follows PyTorch nn.LSTM: [i, f, g, o].
# ---------------------------------------------------------------------------
def lstm_kernel(len_ref, pre_ref, whh_ref, h0_ref, c0_ref,
                out_ref, hn_ref, cn_ref):
    TT, B, G = pre_ref.shape          # G = 4H
    H = hn_ref.shape[-1]
    blk = pl.program_id(0)

    # h_n / c_n output blocks are resident across the whole grid (constant
    # block index) and double as the h/c carry.  Initialize them once.
    @pl.when(blk == 0)
    def _():
        hn_ref[...] = h0_ref[...]
        cn_ref[...] = c0_ref[...]

    whh = whh_ref[...]                # (H, 4H), resident in VMEM / vregs
    lens = len_ref[...]               # (B, 1) int32, loaded once per chunk

    # Lane-id mask: lanes [2H, 3H) are the 'g' gate -> tanh, everything else
    # -> sigmoid.  Built once, applied to the full lane-dense (B, 4H) tile.
    lane = jax.lax.broadcasted_iota(jnp.int32, (B, G), 1)
    is_g = (lane >= 2 * H) & (lane < 3 * H)

    t0 = blk * TT                     # global time offset of this chunk

    def step(t, carry):
        h, c = carry
        # Pre-activations already contain x_t @ W_ih^T + b_ih + b_hh.
        gates = pre_ref[t] + jnp.dot(h, whh, preferred_element_type=jnp.float32)
        act = jnp.where(is_g, jnp.tanh(gates), jax.nn.sigmoid(gates))
        i_g = act[:, 0 * H:1 * H]
        f_g = act[:, 1 * H:2 * H]
        g_g = act[:, 2 * H:3 * H]
        o_g = act[:, 3 * H:4 * H]

        c_new = f_g * c + i_g * g_g
        h_new = o_g * jnp.tanh(c_new)

        valid = (t0 + t) < lens                            # (B, 1) bool
        out_ref[t] = jnp.where(valid, h_new, 0.0)
        return jnp.where(valid, h_new, h), jnp.where(valid, c_new, c)

    h_n, c_n = jax.lax.fori_loop(0, TT, step, (hn_ref[...], cn_ref[...]),
                                 unroll=bool(TT <= 16))
    hn_ref[...] = h_n
    cn_ref[...] = c_n


def lstm_pallas(x_tbe, lengths, w_ih, w_hh, b_ih, b_hh, h0, c0, *, t_chunk=128):
    """x_tbe: (T, B, E) f32 time-major; lengths: (B,) int32; weights in PyTorch
    layout w_ih: (4H, E), w_hh: (4H, H).
    Returns (out (T, B, H), h_n (B, H), c_n (B, H))."""
    T, B, E = x_tbe.shape
    H = h0.shape[-1]

    # --- Hoisted input projection: one large MXU-friendly matmul outside the
    #     serial loop, done in plain XLA. ---
    pre = (jnp.einsum('tbe,ge->tbg', x_tbe.astype(jnp.float32),
                      w_ih.astype(jnp.float32),
                      preferred_element_type=jnp.float32)
           + (b_ih + b_hh).astype(jnp.float32))            # (T, B, 4H)

    whh = w_hh.T.astype(jnp.float32)                        # (H, 4H)

    # --- Pad batch to a multiple of 8 so (B, H) tiles fill whole sublanes.
    #     Padded rows get length 0 -> frozen at zero state, zero outputs. ---
    Bp = max(8, ((B + 7) // 8) * 8)
    if Bp != B:
        pad = Bp - B
        pre = jnp.pad(pre, ((0, 0), (0, pad), (0, 0)))
        lengths = jnp.pad(lengths, (0, pad))
        h0 = jnp.pad(h0, ((0, pad), (0, 0)))
        c0 = jnp.pad(c0, ((0, pad), (0, 0)))
    lens = lengths.reshape(Bp, 1).astype(jnp.int32)

    # --- Tile the time axis: chunk of up to t_chunk steps per grid iteration
    #     so pre/out tiles are double-buffered by the Pallas pipeline. ---
    TT = min(T, t_chunk)
    Tp = ((T + TT - 1) // TT) * TT
    if Tp != T:
        pre = jnp.pad(pre, ((0, Tp - T), (0, 0), (0, 0)))
    n_blk = Tp // TT

    out, h_n, c_n = pl.pallas_call(
        lstm_kernel,
        out_shape=(jax.ShapeDtypeStruct((Tp, Bp, H), jnp.float32),
                   jax.ShapeDtypeStruct((Bp, H), jnp.float32),
                   jax.ShapeDtypeStruct((Bp, H), jnp.float32)),
        grid_spec=pltpu.PrefetchScalarGridSpec(
            num_scalar_prefetch=0,
            grid=(n_blk,),
            in_specs=[
                pl.BlockSpec((Bp, 1), lambda i: (0, 0)),            # lengths
                pl.BlockSpec((TT, Bp, 4 * H), lambda i: (i, 0, 0)),  # pre-acts
                pl.BlockSpec((H, 4 * H), lambda i: (0, 0)),          # W_hh^T
                pl.BlockSpec((Bp, H), lambda i: (0, 0)),             # h0
                pl.BlockSpec((Bp, H), lambda i: (0, 0)),             # c0
            ],
            out_specs=[
                pl.BlockSpec((TT, Bp, H), lambda i: (i, 0, 0)),      # outputs
                pl.BlockSpec((Bp, H), lambda i: (0, 0)),             # h_n
                pl.BlockSpec((Bp, H), lambda i: (0, 0)),             # c_n
            ],
        ),
        compiler_params=pltpu.CompilerParams(
            dimension_semantics=("arbitrary",)),   # sequential recurrence
    )(lens, pre, whh, h0.astype(jnp.float32), c0.astype(jnp.float32))

    return out[:T, :B, :], h_n[:B], c_n[:B]


# ---------------------------------------------------------------------------
# RNNModule equivalent (LSTM, 1 layer, unidirectional, eval-mode dropout).
# ---------------------------------------------------------------------------
class RNNModuleJax:
    def __init__(self, ntokens, emb_size, hidden_size, key):
        k_emb, k1, k2, k3, k4 = jax.random.split(key, 5)
        # frozen "GloVe-like" embedding matrix, deterministic synthetic init
        self.emb = jax.random.normal(k_emb, (ntokens, emb_size), jnp.float32) * 0.1
        s = 1.0 / jnp.sqrt(hidden_size)
        self.w_ih = jax.random.uniform(k1, (4 * hidden_size, emb_size), jnp.float32, -s, s)
        self.w_hh = jax.random.uniform(k2, (4 * hidden_size, hidden_size), jnp.float32, -s, s)
        self.b_ih = jax.random.uniform(k3, (4 * hidden_size,), jnp.float32, -s, s)
        self.b_hh = jax.random.uniform(k4, (4 * hidden_size,), jnp.float32, -s, s)
        self.hidden_size = hidden_size

    def forward(self, tokens, lengths, init_hidden=None):
        B, T = tokens.shape
        H = self.hidden_size
        # --- sort_tensors: descending by length ---
        order = jnp.argsort(-lengths)
        reorder = jnp.argsort(order)
        tokens_s = tokens[order]
        lengths_s = lengths[order]
        # --- embedding lookup (frozen), gathered directly in time-major order
        #     + dropout (eval mode => identity) ---
        # TODO(synk): training-mode dropout (nn.Dropout) not applied; eval semantics used.
        # TODO(synk): only rec_type='LSTM', nlayers=1, bidirect=False implemented.
        x_tbe = jnp.take(self.emb, tokens_s.T, axis=0)        # (T, B, E)
        if init_hidden is None:
            h0 = jnp.zeros((B, H), jnp.float32)
            c0 = jnp.zeros((B, H), jnp.float32)
        else:
            h0, c0 = init_hidden[0][0], init_hidden[1][0]
        # --- recurrent layer (packed-sequence semantics) via Pallas ---
        out_tbh, h_n, c_n = lstm_pallas(x_tbe, lengths_s, self.w_ih, self.w_hh,
                                        self.b_ih, self.b_hh, h0, c0)
        rec_output = jnp.transpose(out_tbh, (1, 0, 2))        # (B, T, H) batch_first
        rec_hidden = (h_n[None, :, :], c_n[None, :, :])       # (1, B, H) each
        # --- resort back to original order ---
        rec_output = rec_output[reorder]                      # dim=0
        rec_hidden = tuple(h[:, reorder, :] for h in rec_hidden)  # dim=1
        return rec_output, rec_hidden


# ---------------------------------------------------------------------------
# Pure-JAX reference (lax.scan) for correctness checking.
# ---------------------------------------------------------------------------
def ref_lstm(x_tbe, lengths, w_ih, w_hh, b_ih, b_hh, h0, c0):
    T, B, E = x_tbe.shape
    H = h0.shape[-1]
    wih, whh = w_ih.T, w_hh.T
    b = (b_ih + b_hh)[None, :]

    def step(carry, inp):
        h, c = carry
        xt, t = inp
        gates = xt @ wih + h @ whh + b
        i = jax.nn.sigmoid(gates[:, 0 * H:1 * H])
        f = jax.nn.sigmoid(gates[:, 1 * H:2 * H])
        g = jnp.tanh(gates[:, 2 * H:3 * H])
        o = jax.nn.sigmoid(gates[:, 3 * H:4 * H])
        c_new = f * c + i * g
        h_new = o * jnp.tanh(c_new)
        valid = (t < lengths)[:, None]
        h2 = jnp.where(valid, h_new, h)
        c2 = jnp.where(valid, c_new, c)
        y = jnp.where(valid, h_new, 0.0)
        return (h2, c2), y

    (h_n, c_n), ys = jax.lax.scan(step, (h0, c0), (x_tbe, jnp.arange(T)))
    return ys, h_n, c_n


if __name__ == "__main__":
    B, T, E, H, V = 4, 8, 32, 32, 50

    key = jax.random.PRNGKey(0)
    k_mod, k_tok = jax.random.split(key)
    module = RNNModuleJax(ntokens=V, emb_size=E, hidden_size=H, key=k_mod)

    tokens = jax.random.randint(k_tok, (B, T), 0, V, dtype=jnp.int32)
    lengths = jnp.array([5, 8, 3, 8], dtype=jnp.int32)

    rec_output, (h_n, c_n) = module.forward(tokens, lengths)
    jax.block_until_ready((rec_output, h_n, c_n))

    # --- correctness check against pure-JAX reference of the same forward ---
    order = jnp.argsort(-lengths)
    reorder = jnp.argsort(order)
    emb = jnp.take(module.emb, tokens[order], axis=0)
    x_tbe = jnp.transpose(emb, (1, 0, 2))
    ys, h_ref, c_ref = ref_lstm(x_tbe, lengths[order], module.w_ih, module.w_hh,
                                module.b_ih, module.b_hh,
                                jnp.zeros((B, H)), jnp.zeros((B, H)))
    out_ref = jnp.transpose(ys, (1, 0, 2))[reorder]
    h_ref = h_ref[None, reorder, :]
    c_ref = c_ref[None, reorder, :]

    assert rec_output.shape == (B, T, H)
    assert h_n.shape == (1, B, H) and c_n.shape == (1, B, H)
    assert jnp.allclose(rec_output, out_ref, atol=1e-5, rtol=1e-5)
    assert jnp.allclose(h_n, h_ref, atol=1e-5, rtol=1e-5)
    assert jnp.allclose(c_n, c_ref, atol=1e-5, rtol=1e-5)

    print("KERNEL_OK")
</pallas_src>

<mosaic_0001>
module attributes {stable_mosaic.version = 11 : i64} {
  func.func @lstm_kernel(%arg0: i32, %arg1: memref<8x1xi32, #tpu.memory_space<vmem>>, %arg2: memref<8x8x128xf32, #tpu.memory_space<vmem>>, %arg3: memref<32x128xf32, #tpu.memory_space<vmem>>, %arg4: memref<8x32xf32, #tpu.memory_space<vmem>>, %arg5: memref<8x32xf32, #tpu.memory_space<vmem>>, %arg6: memref<8x8x32xf32, #tpu.memory_space<vmem>>, %arg7: memref<8x32xf32, #tpu.memory_space<vmem>>, %arg8: memref<8x32xf32, #tpu.memory_space<vmem>>) attributes {dimension_semantics = [#tpu.dimension_semantics<arbitrary>], iteration_bounds = array<i64: 1>, scalar_prefetch = 0 : i64, scratch_operands = 0 : i64, tpu.core_type = #tpu.core_type<tc>, window_params = [{pipeline_mode = #tpu.pipeline_mode<synchronous>, transform_indices = @transform_0, window_bounds = array<i64: 8, 1>}, {transform_indices = @transform_1, window_bounds = array<i64: 8, 8, 128>}, {pipeline_mode = #tpu.pipeline_mode<synchronous>, transform_indices = @transform_2, window_bounds = array<i64: 32, 128>}, {pipeline_mode = #tpu.pipeline_mode<synchronous>, transform_indices = @transform_3, window_bounds = array<i64: 8, 32>}, {pipeline_mode = #tpu.pipeline_mode<synchronous>, transform_indices = @transform_4, window_bounds = array<i64: 8, 32>}, {transform_indices = @transform_5, window_bounds = array<i64: 8, 8, 32>}, {pipeline_mode = #tpu.pipeline_mode<synchronous>, transform_indices = @transform_6, window_bounds = array<i64: 8, 32>}, {pipeline_mode = #tpu.pipeline_mode<synchronous>, transform_indices = @transform_7, window_bounds = array<i64: 8, 32>}]} {
    %c0_i32 = arith.constant 0 : i32
    %0 = arith.cmpi eq, %arg0, %c0_i32 : i32
    %1 = arith.extui %0 : i1 to i32
    %c0_i32_0 = arith.constant 0 : i32
    %2 = arith.cmpi ne, %1, %c0_i32_0 : i32
    scf.if %2 {
      %c0_69 = arith.constant 0 : index
      %c0_70 = arith.constant 0 : index
      %320 = vector.load %arg4[%c0_69, %c0_70] : memref<8x32xf32, #tpu.memory_space<vmem>>, vector<8x32xf32>
      %c0_71 = arith.constant 0 : index
      %c0_72 = arith.constant 0 : index
      %321 = vector.load %arg7[%c0_71, %c0_72] : memref<8x32xf32, #tpu.memory_space<vmem>>, vector<8x32xf32>
      tpu.vector_store %arg7[%c0_71, %c0_72], %320 {strides = array<i32>} : memref<8x32xf32, #tpu.memory_space<vmem>>, vector<8x32xf32>,
      %c0_73 = arith.constant 0 : index
      %c0_74 = arith.constant 0 : index
      %322 = vector.load %arg5[%c0_73, %c0_74] : memref<8x32xf32, #tpu.memory_space<vmem>>, vector<8x32xf32>
      %c0_75 = arith.constant 0 : index
      %c0_76 = arith.constant 0 : index
      %323 = vector.load %arg8[%c0_75, %c0_76] : memref<8x32xf32, #tpu.memory_space<vmem>>, vector<8x32xf32>
      tpu.vector_store %arg8[%c0_75, %c0_76], %322 {strides = array<i32>} : memref<8x32xf32, #tpu.memory_space<vmem>>, vector<8x32xf32>,
    } else {
    }
    %c0 = arith.constant 0 : index
    %c0_1 = arith.constant 0 : index
    %3 = vector.load %arg3[%c0, %c0_1] : memref<32x128xf32, #tpu.memory_space<vmem>>, vector<32x128xf32>
    %c0_2 = arith.constant 0 : index
    %c0_3 = arith.constant 0 : index
    %4 = vector.load %arg1[%c0_2, %c0_3] : memref<8x1xi32, #tpu.memory_space<vmem>>, vector<8x1xi32>
    %5 = tpu.iota {dimensions = array<i32: 1>} : vector<8x128xi32>
    %c64_i32 = arith.constant 64 : i32
    %6 = vector.broadcast %c64_i32 : i32 to vector<8x128xi32>
    %7 = arith.cmpi sge, %5, %6 : vector<8x128xi32>
    %c96_i32 = arith.constant 96 : i32
    %8 = vector.broadcast %c96_i32 : i32 to vector<8x128xi32>
    %9 = arith.cmpi slt, %5, %8 : vector<8x128xi32>
    %10 = arith.andi %7, %9 : vector<8x128xi1>
    %c8_i32 = arith.constant 8 : i32
    %11 = arith.muli %arg0, %c8_i32 : i32
    %c0_4 = arith.constant 0 : index
    %c0_5 = arith.constant 0 : index
    %12 = vector.load %arg7[%c0_4, %c0_5] : memref<8x32xf32, #tpu.memory_space<vmem>>, vector<8x32xf32>
    %c0_6 = arith.constant 0 : index
    %c0_7 = arith.constant 0 : index
    %13 = vector.load %arg8[%c0_6, %c0_7] : memref<8x32xf32, #tpu.memory_space<vmem>>, vector<8x32xf32>
    %c0_i32_8 = arith.constant 0 : i32
    %14 = arith.index_cast %c0_i32_8 : i32 to index
    %c0_9 = arith.constant 0 : index
    %c0_10 = arith.constant 0 : index
    %15 = vector.load %arg2[%14, %c0_9, %c0_10] : memref<8x8x128xf32, #tpu.memory_space<vmem>>, vector<1x8x128xf32>
    %16 = vector.shape_cast %15 : vector<1x8x128xf32> to vector<8x128xf32>
    %cst = arith.constant dense<0.000000e+00> : vector<8x128xf32>
    %17 = tpu.matmul %12, %3, %cst {dimension_numbers = #tpu.dot_dimension_numbers<[1], [0], [0], [1], [0, 0, 1, 1], [], []>} : vector<8x32xf32>, vector<32x128xf32>, vector<8x128xf32> -> vector<8x128xf32>
    %18 = arith.addf %16, %17 : vector<8x128xf32>
    %19 = math.tanh %18 : vector<8x128xf32>
    %20 = arith.negf %18 : vector<8x128xf32>
    %21 = math.exp %20 : vector<8x128xf32>
    %cst_11 = arith.constant 1.000000e+00 : f32
    %22 = vector.broadcast %cst_11 : f32 to vector<8x128xf32>
    %23 = arith.addf %22, %21 : vector<8x128xf32>
    %24 = arith.divf %22, %23 : vector<8x128xf32>
    %25 = arith.select %10, %19, %24 : vector<8x128xi1>, vector<8x128xf32>
    %26 = vector.extract_strided_slice %25 {offsets = [0, 0], sizes = [8, 32], strides = [1, 1]} : vector<8x128xf32> to vector<8x32xf32>
    %27 = vector.extract_strided_slice %25 {offsets = [0, 32], sizes = [8, 32], strides = [1, 1]} : vector<8x128xf32> to vector<8x32xf32>
    %28 = vector.extract_strided_slice %25 {offsets = [0, 64], sizes = [8, 32], strides = [1, 1]} : vector<8x128xf32> to vector<8x32xf32>
    %29 = vector.extract_strided_slice %25 {offsets = [0, 96], sizes = [8, 32], strides = [1, 1]} : vector<8x128xf32> to vector<8x32xf32>
    %30 = arith.mulf %27, %13 : vector<8x32xf32>
    %31 = arith.mulf %26, %28 : vector<8x32xf32>
    %32 = arith.addf %30, %31 : vector<8x32xf32>
    %33 = math.tanh %32 : vector<8x32xf32>
    %34 = arith.mulf %29, %33 : vector<8x32xf32>
    %35 = arith.addi %11, %c0_i32_8 : i32
    %36 = vector.broadcast %35 : i32 to vector<8x1xi32>
    %37 = arith.cmpi slt, %36, %4 : vector<8x1xi32>
    %cst_12 = arith.constant 0.000000e+00 : f32
    %38 = vector.shape_cast %37 : vector<8x1xi1> to vector<8x1xi1>
    %39 = vector.broadcast %38 : vector<8x1xi1> to vector<8x32xi1>
    %40 = vector.broadcast %cst_12 : f32 to vector<8x32xf32>
    %41 = arith.select %39, %34, %40 : vector<8x32xi1>, vector<8x32xf32>
    %42 = arith.index_cast %c0_i32_8 : i32 to index
    %c0_13 = arith.constant 0 : index
    %c0_14 = arith.constant 0 : index
    %43 = vector.load %arg6[%42, %c0_13, %c0_14] : memref<8x8x32xf32, #tpu.memory_space<vmem>>, vector<1x8x32xf32>
    %44 = vector.shape_cast %43 : vector<1x8x32xf32> to vector<8x32xf32>
    %45 = vector.shape_cast %41 : vector<8x32xf32> to vector<1x8x32xf32>
    tpu.vector_store %arg6[%42, %c0_13, %c0_14], %45 {strides = array<i32>} : memref<8x8x32xf32, #tpu.memory_space<vmem>>, vector<1x8x32xf32>,
    %46 = vector.shape_cast %37 : vector<8x1xi1> to vector<8x1xi1>
    %47 = vector.broadcast %46 : vector<8x1xi1> to vector<8x32xi1>
    %48 = arith.select %47, %34, %12 : vector<8x32xi1>, vector<8x32xf32>
    %49 = vector.shape_cast %37 : vector<8x1xi1> to vector<8x1xi1>
    %50 = vector.broadcast %49 : vector<8x1xi1> to vector<8x32xi1>
    %51 = arith.select %50, %32, %13 : vector<8x32xi1>, vector<8x32xf32>
    %c1_i32 = arith.constant 1 : i32
    %52 = arith.index_cast %c1_i32 : i32 to index
    %c0_15 = arith.constant 0 : index
    %c0_16 = arith.constant 0 : index
    %53 = vector.load %arg2[%52, %c0_15, %c0_16] : memref<8x8x128xf32, #tpu.memory_space<vmem>>, vector<1x8x128xf32>
    %54 = vector.shape_cast %53 : vector<1x8x128xf32> to vector<8x128xf32>
    %cst_17 = arith.constant dense<0.000000e+00> : vector<8x128xf32>
    %55 = tpu.matmul %48, %3, %cst_17 {dimension_numbers = #tpu.dot_dimension_numbers<[1], [0], [0], [1], [0, 0, 1, 1], [], []>} : vector<8x32xf32>, vector<32x128xf32>, vector<8x128xf32> -> vector<8x128xf32>
    %56 = arith.addf %54, %55 : vector<8x128xf32>
    %57 = math.tanh %56 : vector<8x128xf32>
    %58 = arith.negf %56 : vector<8x128xf32>
    %59 = math.exp %58 : vector<8x128xf32>
    %cst_18 = arith.constant 1.000000e+00 : f32
    %60 = vector.broadcast %cst_18 : f32 to vector<8x128xf32>
    %61 = arith.addf %60, %59 : vector<8x128xf32>
    %62 = arith.divf %60, %61 : vector<8x128xf32>
    %63 = arith.select %10, %57, %62 : vector<8x128xi1>, vector<8x128xf32>
    %64 = vector.extract_strided_slice %63 {offsets = [0, 0], sizes = [8, 32], strides = [1, 1]} : vector<8x128xf32> to vector<8x32xf32>
    %65 = vector.extract_strided_slice %63 {offsets = [0, 32], sizes = [8, 32], strides = [1, 1]} : vector<8x128xf32> to vector<8x32xf32>
    %66 = vector.extract_strided_slice %63 {offsets = [0, 64], sizes = [8, 32], strides = [1, 1]} : vector<8x128xf32> to vector<8x32xf32>
    %67 = vector.extract_strided_slice %63 {offsets = [0, 96], sizes = [8, 32], strides = [1, 1]} : vector<8x128xf32> to vector<8x32xf32>
    %68 = arith.mulf %65, %51 : vector<8x32xf32>
    %69 = arith.mulf %64, %66 : vector<8x32xf32>
    %70 = arith.addf %68, %69 : vector<8x32xf32>
    %71 = math.tanh %70 : vector<8x32xf32>
    %72 = arith.mulf %67, %71 : vector<8x32xf32>
    %73 = arith.addi %11, %c1_i32 : i32
    %74 = vector.broadcast %73 : i32 to vector<8x1xi32>
    %75 = arith.cmpi slt, %74, %4 : vector<8x1xi32>
    %cst_19 = arith.constant 0.000000e+00 : f32
    %76 = vector.shape_cast %75 : vector<8x1xi1> to vector<8x1xi1>
    %77 = vector.broadcast %76 : vector<8x1xi1> to vector<8x32xi1>
    %78 = vector.broadcast %cst_19 : f32 to vector<8x32xf32>
    %79 = arith.select %77, %72, %78 : vector<8x32xi1>, vector<8x32xf32>
    %80 = arith.index_cast %c1_i32 : i32 to index
    %c0_20 = arith.constant 0 : index
    %c0_21 = arith.constant 0 : index
    %81 = vector.load %arg6[%80, %c0_20, %c0_21] : memref<8x8x32xf32, #tpu.memory_space<vmem>>, vector<1x8x32xf32>
    %82 = vector.shape_cast %81 : vector<1x8x32xf32> to vector<8x32xf32>
    %83 = vector.shape_cast %79 : vector<8x32xf32> to vector<1x8x32xf32>
    tpu.vector_store %arg6[%80, %c0_20, %c0_21], %83 {strides = array<i32>} : memref<8x8x32xf32, #tpu.memory_space<vmem>>, vector<1x8x32xf32>,
    %84 = vector.shape_cast %75 : vector<8x1xi1> to vector<8x1xi1>
    %85 = vector.broadcast %84 : vector<8x1xi1> to vector<8x32xi1>
    %86 = arith.select %85, %72, %48 : vector<8x32xi1>, vector<8x32xf32>
    %87 = vector.shape_cast %75 : vector<8x1xi1> to vector<8x1xi1>
    %88 = vector.broadcast %87 : vector<8x1xi1> to vector<8x32xi1>
    %89 = arith.select %88, %70, %51 : vector<8x32xi1>, vector<8x32xf32>
    %c2_i32 = arith.constant 2 : i32
    %90 = arith.index_cast %c2_i32 : i32 to index
    %c0_22 = arith.constant 0 : index
    %c0_23 = arith.constant 0 : index
    %91 = vector.load %arg2[%90, %c0_22, %c0_23] : memref<8x8x128xf32, #tpu.memory_space<vmem>>, vector<1x8x128xf32>
    %92 = vector.shape_cast %91 : vector<1x8x128xf32> to vector<8x128xf32>
    %cst_24 = arith.constant dense<0.000000e+00> : vector<8x128xf32>
    %93 = tpu.matmul %86, %3, %cst_24 {dimension_numbers = #tpu.dot_dimension_numbers<[1], [0], [0], [1], [0, 0, 1, 1], [], []>} : vector<8x32xf32>, vector<32x128xf32>, vector<8x128xf32> -> vector<8x128xf32>
    %94 = arith.addf %92, %93 : vector<8x128xf32>
    %95 = math.tanh %94 : vector<8x128xf32>
    %96 = arith.negf %94 : vector<8x128xf32>
    %97 = math.exp %96 : vector<8x128xf32>
    %cst_25 = arith.constant 1.000000e+00 : f32
    %98 = vector.broadcast %cst_25 : f32 to vector<8x128xf32>
    %99 = arith.addf %98, %97 : vector<8x128xf32>
    %100 = arith.divf %98, %99 : vector<8x128xf32>
    %101 = arith.select %10, %95, %100 : vector<8x128xi1>, vector<8x128xf32>
    %102 = vector.extract_strided_slice %101 {offsets = [0, 0], sizes = [8, 32], strides = [1, 1]} : vector<8x128xf32> to vector<8x32xf32>
    %103 = vector.extract_strided_slice %101 {offsets = [0, 32], sizes = [8, 32], strides = [1, 1]} : vector<8x128xf32> to vector<8x32xf32>
    %104 = vector.extract_strided_slice %101 {offsets = [0, 64], sizes = [8, 32], strides = [1, 1]} : vector<8x128xf32> to vector<8x32xf32>
    %105 = vector.extract_strided_slice %101 {offsets = [0, 96], sizes = [8, 32], strides = [1, 1]} : vector<8x128xf32> to vector<8x32xf32>
    %106 = arith.mulf %103, %89 : vector<8x32xf32>
    %107 = arith.mulf %102, %104 : vector<8x32xf32>
    %108 = arith.addf %106, %107 : vector<8x32xf32>
    %109 = math.tanh %108 : vector<8x32xf32>
    %110 = arith.mulf %105, %109 : vector<8x32xf32>
    %111 = arith.addi %11, %c2_i32 : i32
    %112 = vector.broadcast %111 : i32 to vector<8x1xi32>
    %113 = arith.cmpi slt, %112, %4 : vector<8x1xi32>
    %cst_26 = arith.constant 0.000000e+00 : f32
    %114 = vector.shape_cast %113 : vector<8x1xi1> to vector<8x1xi1>
    %115 = vector.broadcast %114 : vector<8x1xi1> to vector<8x32xi1>
    %116 = vector.broadcast %cst_26 : f32 to vector<8x32xf32>
    %117 = arith.select %115, %110, %116 : vector<8x32xi1>, vector<8x32xf32>
    %118 = arith.index_cast %c2_i32 : i32 to index
    %c0_27 = arith.constant 0 : index
    %c0_28 = arith.constant 0 : index
    %119 = vector.load %arg6[%118, %c0_27, %c0_28] : memref<8x8x32xf32, #tpu.memory_space<vmem>>, vector<1x8x32xf32>
    %120 = vector.shape_cast %119 : vector<1x8x32xf32> to vector<8x32xf32>
    %121 = vector.shape_cast %117 : vector<8x32xf32> to vector<1x8x32xf32>
    tpu.vector_store %arg6[%118, %c0_27, %c0_28], %121 {strides = array<i32>} : memref<8x8x32xf32, #tpu.memory_space<vmem>>, vector<1x8x32xf32>,
    %122 = vector.shape_cast %113 : vector<8x1xi1> to vector<8x1xi1>
    %123 = vector.broadcast %122 : vector<8x1xi1> to vector<8x32xi1>
    %124 = arith.select %123, %110, %86 : vector<8x32xi1>, vector<8x32xf32>
    %125 = vector.shape_cast %113 : vector<8x1xi1> to vector<8x1xi1>
    %126 = vector.broadcast %125 : vector<8x1xi1> to vector<8x32xi1>
    %127 = arith.select %126, %108, %89 : vector<8x32xi1>, vector<8x32xf32>
    %c3_i32 = arith.constant 3 : i32
    %128 = arith.index_cast %c3_i32 : i32 to index
    %c0_29 = arith.constant 0 : index
    %c0_30 = arith.constant 0 : index
    %129 = vector.load %arg2[%128, %c0_29, %c0_30] : memref<8x8x128xf32, #tpu.memory_space<vmem>>, vector<1x8x128xf32>
    %130 = vector.shape_cast %129 : vector<1x8x128xf32> to vector<8x128xf32>
    %cst_31 = arith.constant dense<0.000000e+00> : vector<8x128xf32>
    %131 = tpu.matmul %124, %3, %cst_31 {dimension_numbers = #tpu.dot_dimension_numbers<[1], [0], [0], [1], [0, 0, 1, 1], [], []>} : vector<8x32xf32>, vector<32x128xf32>, vector<8x128xf32> -> vector<8x128xf32>
    %132 = arith.addf %130, %131 : vector<8x128xf32>
    %133 = math.tanh %132 : vector<8x128xf32>
    %134 = arith.negf %132 : vector<8x128xf32>
    %135 = math.exp %134 : vector<8x128xf32>
    %cst_32 = arith.constant 1.000000e+00 : f32
    %136 = vector.broadcast %cst_32 : f32 to vector<8x128xf32>
    %137 = arith.addf %136, %135 : vector<8x128xf32>
    %138 = arith.divf %136, %137 : vector<8x128xf32>
    %139 = arith.select %10, %133, %138 : vector<8x128xi1>, vector<8x128xf32>
    %140 = vector.extract_strided_slice %139 {offsets = [0, 0], sizes = [8, 32], strides = [1, 1]} : vector<8x128xf32> to vector<8x32xf32>
    %141 = vector.extract_strided_slice %139 {offsets = [0, 32], sizes = [8, 32], strides = [1, 1]} : vector<8x128xf32> to vector<8x32xf32>
    %142 = vector.extract_strided_slice %139 {offsets = [0, 64], sizes = [8, 32], strides = [1, 1]} : vector<8x128xf32> to vector<8x32xf32>
    %143 = vector.extract_strided_slice %139 {offsets = [0, 96], sizes = [8, 32], strides = [1, 1]} : vector<8x128xf32> to vector<8x32xf32>
    %144 = arith.mulf %141, %127 : vector<8x32xf32>
    %145 = arith.mulf %140, %142 : vector<8x32xf32>
    %146 = arith.addf %144, %145 : vector<8x32xf32>
    %147 = math.tanh %146 : vector<8x32xf32>
    %148 = arith.mulf %143, %147 : vector<8x32xf32>
    %149 = arith.addi %11, %c3_i32 : i32
    %150 = vector.broadcast %149 : i32 to vector<8x1xi32>
    %151 = arith.cmpi slt, %150, %4 : vector<8x1xi32>
    %cst_33 = arith.constant 0.000000e+00 : f32
    %152 = vector.shape_cast %151 : vector<8x1xi1> to vector<8x1xi1>
    %153 = vector.broadcast %152 : vector<8x1xi1> to vector<8x32xi1>
    %154 = vector.broadcast %cst_33 : f32 to vector<8x32xf32>
    %155 = arith.select %153, %148, %154 : vector<8x32xi1>, vector<8x32xf32>
    %156 = arith.index_cast %c3_i32 : i32 to index
    %c0_34 = arith.constant 0 : index
    %c0_35 = arith.constant 0 : index
    %157 = vector.load %arg6[%156, %c0_34, %c0_35] : memref<8x8x32xf32, #tpu.memory_space<vmem>>, vector<1x8x32xf32>
    %158 = vector.shape_cast %157 : vector<1x8x32xf32> to vector<8x32xf32>
    %159 = vector.shape_cast %155 : vector<8x32xf32> to vector<1x8x32xf32>
    tpu.vector_store %arg6[%156, %c0_34, %c0_35], %159 {strides = array<i32>} : memref<8x8x32xf32, #tpu.memory_space<vmem>>, vector<1x8x32xf32>,
    %160 = vector.shape_cast %151 : vector<8x1xi1> to vector<8x1xi1>
    %161 = vector.broadcast %160 : vector<8x1xi1> to vector<8x32xi1>
    %162 = arith.select %161, %148, %124 : vector<8x32xi1>, vector<8x32xf32>
    %163 = vector.shape_cast %151 : vector<8x1xi1> to vector<8x1xi1>
    %164 = vector.broadcast %163 : vector<8x1xi1> to vector<8x32xi1>
    %165 = arith.select %164, %146, %127 : vector<8x32xi1>, vector<8x32xf32>
    %c4_i32 = arith.constant 4 : i32
    %166 = arith.index_cast %c4_i32 : i32 to index
    %c0_36 = arith.constant 0 : index
    %c0_37 = arith.constant 0 : index
    %167 = vector.load %arg2[%166, %c0_36, %c0_37] : memref<8x8x128xf32, #tpu.memory_space<vmem>>, vector<1x8x128xf32>
    %168 = vector.shape_cast %167 : vector<1x8x128xf32> to vector<8x128xf32>
    %cst_38 = arith.constant dense<0.000000e+00> : vector<8x128xf32>
    %169 = tpu.matmul %162, %3, %cst_38 {dimension_numbers = #tpu.dot_dimension_numbers<[1], [0], [0], [1], [0, 0, 1, 1], [], []>} : vector<8x32xf32>, vector<32x128xf32>, vector<8x128xf32> -> vector<8x128xf32>
    %170 = arith.addf %168, %169 : vector<8x128xf32>
    %171 = math.tanh %170 : vector<8x128xf32>
    %172 = arith.negf %170 : vector<8x128xf32>
    %173 = math.exp %172 : vector<8x128xf32>
    %cst_39 = arith.constant 1.000000e+00 : f32
    %174 = vector.broadcast %cst_39 : f32 to vector<8x128xf32>
    %175 = arith.addf %174, %173 : vector<8x128xf32>
    %176 = arith.divf %174, %175 : vector<8x128xf32>
    %177 = arith.select %10, %171, %176 : vector<8x128xi1>, vector<8x128xf32>
    %178 = vector.extract_strided_slice %177 {offsets = [0, 0], sizes = [8, 32], strides = [1, 1]} : vector<8x128xf32> to vector<8x32xf32>
    %179 = vector.extract_strided_slice %177 {offsets = [0, 32], sizes = [8, 32], strides = [1, 1]} : vector<8x128xf32> to vector<8x32xf32>
    %180 = vector.extract_strided_slice %177 {offsets = [0, 64], sizes = [8, 32], strides = [1, 1]} : vector<8x128xf32> to vector<8x32xf32>
    %181 = vector.extract_strided_slice %177 {offsets = [0, 96], sizes = [8, 32], strides = [1, 1]} : vector<8x128xf32> to vector<8x32xf32>
    %182 = arith.mulf %179, %165 : vector<8x32xf32>
    %183 = arith.mulf %178, %180 : vector<8x32xf32>
    %184 = arith.addf %182, %183 : vector<8x32xf32>
    %185 = math.tanh %184 : vector<8x32xf32>
    %186 = arith.mulf %181, %185 : vector<8x32xf32>
    %187 = arith.addi %11, %c4_i32 : i32
    %188 = vector.broadcast %187 : i32 to vector<8x1xi32>
    %189 = arith.cmpi slt, %188, %4 : vector<8x1xi32>
    %cst_40 = arith.constant 0.000000e+00 : f32
    %190 = vector.shape_cast %189 : vector<8x1xi1> to vector<8x1xi1>
    %191 = vector.broadcast %190 : vector<8x1xi1> to vector<8x32xi1>
    %192 = vector.broadcast %cst_40 : f32 to vector<8x32xf32>
    %193 = arith.select %191, %186, %192 : vector<8x32xi1>, vector<8x32xf32>
    %194 = arith.index_cast %c4_i32 : i32 to index
    %c0_41 = arith.constant 0 : index
    %c0_42 = arith.constant 0 : index
    %195 = vector.load %arg6[%194, %c0_41, %c0_42] : memref<8x8x32xf32, #tpu.memory_space<vmem>>, vector<1x8x32xf32>
    %196 = vector.shape_cast %195 : vector<1x8x32xf32> to vector<8x32xf32>
    %197 = vector.shape_cast %193 : vector<8x32xf32> to vector<1x8x32xf32>
    tpu.vector_store %arg6[%194, %c0_41, %c0_42], %197 {strides = array<i32>} : memref<8x8x32xf32, #tpu.memory_space<vmem>>, vector<1x8x32xf32>,
    %198 = vector.shape_cast %189 : vector<8x1xi1> to vector<8x1xi1>
    %199 = vector.broadcast %198 : vector<8x1xi1> to vector<8x32xi1>
    %200 = arith.select %199, %186, %162 : vector<8x32xi1>, vector<8x32xf32>
    %201 = vector.shape_cast %189 : vector<8x1xi1> to vector<8x1xi1>
    %202 = vector.broadcast %201 : vector<8x1xi1> to vector<8x32xi1>
    %203 = arith.select %202, %184, %165 : vector<8x32xi1>, vector<8x32xf32>
    %c5_i32 = arith.constant 5 : i32
    %204 = arith.index_cast %c5_i32 : i32 to index
    %c0_43 = arith.constant 0 : index
    %c0_44 = arith.constant 0 : index
    %205 = vector.load %arg2[%204, %c0_43, %c0_44] : memref<8x8x128xf32, #tpu.memory_space<vmem>>, vector<1x8x128xf32>
    %206 = vector.shape_cast %205 : vector<1x8x128xf32> to vector<8x128xf32>
    %cst_45 = arith.constant dense<0.000000e+00> : vector<8x128xf32>
    %207 = tpu.matmul %200, %3, %cst_45 {dimension_numbers = #tpu.dot_dimension_numbers<[1], [0], [0], [1], [0, 0, 1, 1], [], []>} : vector<8x32xf32>, vector<32x128xf32>, vector<8x128xf32> -> vector<8x128xf32>
    %208 = arith.addf %206, %207 : vector<8x128xf32>
    %209 = math.tanh %208 : vector<8x128xf32>
    %210 = arith.negf %208 : vector<8x128xf32>
    %211 = math.exp %210 : vector<8x128xf32>
    %cst_46 = arith.constant 1.000000e+00 : f32
    %212 = vector.broadcast %cst_46 : f32 to vector<8x128xf32>
    %213 = arith.addf %212, %211 : vector<8x128xf32>
    %214 = arith.divf %212, %213 : vector<8x128xf32>
    %215 = arith.select %10, %209, %214 : vector<8x128xi1>, vector<8x128xf32>
    %216 = vector.extract_strided_slice %215 {offsets = [0, 0], sizes = [8, 32], strides = [1, 1]} : vector<8x128xf32> to vector<8x32xf32>
    %217 = vector.extract_strided_slice %215 {offsets = [0, 32], sizes = [8, 32], strides = [1, 1]} : vector<8x128xf32> to vector<8x32xf32>
    %218 = vector.extract_strided_slice %215 {offsets = [0, 64], sizes = [8, 32], strides = [1, 1]} : vector<8x128xf32> to vector<8x32xf32>
    %219 = vector.extract_strided_slice %215 {offsets = [0, 96], sizes = [8, 32], strides = [1, 1]} : vector<8x128xf32> to vector<8x32xf32>
    %220 = arith.mulf %217, %203 : vector<8x32xf32>
    %221 = arith.mulf %216, %218 : vector<8x32xf32>
    %222 = arith.addf %220, %221 : vector<8x32xf32>
    %223 = math.tanh %222 : vector<8x32xf32>
    %224 = arith.mulf %219, %223 : vector<8x32xf32>
    %225 = arith.addi %11, %c5_i32 : i32
    %226 = vector.broadcast %225 : i32 to vector<8x1xi32>
    %227 = arith.cmpi slt, %226, %4 : vector<8x1xi32>
    %cst_47 = arith.constant 0.000000e+00 : f32
    %228 = vector.shape_cast %227 : vector<8x1xi1> to vector<8x1xi1>
    %229 = vector.broadcast %228 : vector<8x1xi1> to vector<8x32xi1>
    %230 = vector.broadcast %cst_47 : f32 to vector<8x32xf32>
    %231 = arith.select %229, %224, %230 : vector<8x32xi1>, vector<8x32xf32>
    %232 = arith.index_cast %c5_i32 : i32 to index
    %c0_48 = arith.constant 0 : index
    %c0_49 = arith.constant 0 : index
    %233 = vector.load %arg6[%232, %c0_48, %c0_49] : memref<8x8x32xf32, #tpu.memory_space<vmem>>, vector<1x8x32xf32>
    %234 = vector.shape_cast %233 : vector<1x8x32xf32> to vector<8x32xf32>
    %235 = vector.shape_cast %231 : vector<8x32xf32> to vector<1x8x32xf32>
    tpu.vector_store %arg6[%232, %c0_48, %c0_49], %235 {strides = array<i32>} : memref<8x8x32xf32, #tpu.memory_space<vmem>>, vector<1x8x32xf32>,
    %236 = vector.shape_cast %227 : vector<8x1xi1> to vector<8x1xi1>
    %237 = vector.broadcast %236 : vector<8x1xi1> to vector<8x32xi1>
    %238 = arith.select %237, %224, %200 : vector<8x32xi1>, vector<8x32xf32>
    %239 = vector.shape_cast %227 : vector<8x1xi1> to vector<8x1xi1>
    %240 = vector.broadcast %239 : vector<8x1xi1> to vector<8x32xi1>
    %241 = arith.select %240, %222, %203 : vector<8x32xi1>, vector<8x32xf32>
    %c6_i32 = arith.constant 6 : i32
    %242 = arith.index_cast %c6_i32 : i32 to index
    %c0_50 = arith.constant 0 : index
    %c0_51 = arith.constant 0 : index
    %243 = vector.load %arg2[%242, %c0_50, %c0_51] : memref<8x8x128xf32, #tpu.memory_space<vmem>>, vector<1x8x128xf32>
    %244 = vector.shape_cast %243 : vector<1x8x128xf32> to vector<8x128xf32>
    %cst_52 = arith.constant dense<0.000000e+00> : vector<8x128xf32>
    %245 = tpu.matmul %238, %3, %cst_52 {dimension_numbers = #tpu.dot_dimension_numbers<[1], [0], [0], [1], [0, 0, 1, 1], [], []>} : vector<8x32xf32>, vector<32x128xf32>, vector<8x128xf32> -> vector<8x128xf32>
    %246 = arith.addf %244, %245 : vector<8x128xf32>
    %247 = math.tanh %246 : vector<8x128xf32>
    %248 = arith.negf %246 : vector<8x128xf32>
    %249 = math.exp %248 : vector<8x128xf32>
    %cst_53 = arith.constant 1.000000e+00 : f32
    %250 = vector.broadcast %cst_53 : f32 to vector<8x128xf32>
    %251 = arith.addf %250, %249 : vector<8x128xf32>
    %252 = arith.divf %250, %251 : vector<8x128xf32>
    %253 = arith.select %10, %247, %252 : vector<8x128xi1>, vector<8x128xf32>
    %254 = vector.extract_strided_slice %253 {offsets = [0, 0], sizes = [8, 32], strides = [1, 1]} : vector<8x128xf32> to vector<8x32xf32>
    %255 = vector.extract_strided_slice %253 {offsets = [0, 32], sizes = [8, 32], strides = [1, 1]} : vector<8x128xf32> to vector<8x32xf32>
    %256 = vector.extract_strided_slice %253 {offsets = [0, 64], sizes = [8, 32], strides = [1, 1]} : vector<8x128xf32> to vector<8x32xf32>
    %257 = vector.extract_strided_slice %253 {offsets = [0, 96], sizes = [8, 32], strides = [1, 1]} : vector<8x128xf32> to vector<8x32xf32>
    %258 = arith.mulf %255, %241 : vector<8x32xf32>
    %259 = arith.mulf %254, %256 : vector<8x32xf32>
    %260 = arith.addf %258, %259 : vector<8x32xf32>
    %261 = math.tanh %260 : vector<8x32xf32>
    %262 = arith.mulf %257, %261 : vector<8x32xf32>
    %263 = arith.addi %11, %c6_i32 : i32
    %264 = vector.broadcast %263 : i32 to vector<8x1xi32>
    %265 = arith.cmpi slt, %264, %4 : vector<8x1xi32>
    %cst_54 = arith.constant 0.000000e+00 : f32
    %266 = vector.shape_cast %265 : vector<8x1xi1> to vector<8x1xi1>
    %267 = vector.broadcast %266 : vector<8x1xi1> to vector<8x32xi1>
    %268 = vector.broadcast %cst_54 : f32 to vector<8x32xf32>
    %269 = arith.select %267, %262, %268 : vector<8x32xi1>, vector<8x32xf32>
    %270 = arith.index_cast %c6_i32 : i32 to index
    %c0_55 = arith.constant 0 : index
    %c0_56 = arith.constant 0 : index
    %271 = vector.load %arg6[%270, %c0_55, %c0_56] : memref<8x8x32xf32, #tpu.memory_space<vmem>>, vector<1x8x32xf32>
    %272 = vector.shape_cast %271 : vector<1x8x32xf32> to vector<8x32xf32>
    %273 = vector.shape_cast %269 : vector<8x32xf32> to vector<1x8x32xf32>
    tpu.vector_store %arg6[%270, %c0_55, %c0_56], %273 {strides = array<i32>} : memref<8x8x32xf32, #tpu.memory_space<vmem>>, vector<1x8x32xf32>,
    %274 = vector.shape_cast %265 : vector<8x1xi1> to vector<8x1xi1>
    %275 = vector.broadcast %274 : vector<8x1xi1> to vector<8x32xi1>
    %276 = arith.select %275, %262, %238 : vector<8x32xi1>, vector<8x32xf32>
    %277 = vector.shape_cast %265 : vector<8x1xi1> to vector<8x1xi1>
    %278 = vector.broadcast %277 : vector<8x1xi1> to vector<8x32xi1>
    %279 = arith.select %278, %260, %241 : vector<8x32xi1>, vector<8x32xf32>
    %c7_i32 = arith.constant 7 : i32
    %280 = arith.index_cast %c7_i32 : i32 to index
    %c0_57 = arith.constant 0 : index
    %c0_58 = arith.constant 0 : index
    %281 = vector.load %arg2[%280, %c0_57, %c0_58] : memref<8x8x128xf32, #tpu.memory_space<vmem>>, vector<1x8x128xf32>
    %282 = vector.shape_cast %281 : vector<1x8x128xf32> to vector<8x128xf32>
    %cst_59 = arith.constant dense<0.000000e+00> : vector<8x128xf32>
    %283 = tpu.matmul %276, %3, %cst_59 {dimension_numbers = #tpu.dot_dimension_numbers<[1], [0], [0], [1], [0, 0, 1, 1], [], []>} : vector<8x32xf32>, vector<32x128xf32>, vector<8x128xf32> -> vector<8x128xf32>
    %284 = arith.addf %282, %283 : vector<8x128xf32>
    %285 = math.tanh %284 : vector<8x128xf32>
    %286 = arith.negf %284 : vector<8x128xf32>
    %287 = math.exp %286 : vector<8x128xf32>
    %cst_60 = arith.constant 1.000000e+00 : f32
    %288 = vector.broadcast %cst_60 : f32 to vector<8x128xf32>
    %289 = arith.addf %288, %287 : vector<8x128xf32>
    %290 = arith.divf %288, %289 : vector<8x128xf32>
    %291 = arith.select %10, %285, %290 : vector<8x128xi1>, vector<8x128xf32>
    %292 = vector.extract_strided_slice %291 {offsets = [0, 0], sizes = [8, 32], strides = [1, 1]} : vector<8x128xf32> to vector<8x32xf32>
    %293 = vector.extract_strided_slice %291 {offsets = [0, 32], sizes = [8, 32], strides = [1, 1]} : vector<8x128xf32> to vector<8x32xf32>
    %294 = vector.extract_strided_slice %291 {offsets = [0, 64], sizes = [8, 32], strides = [1, 1]} : vector<8x128xf32> to vector<8x32xf32>
    %295 = vector.extract_strided_slice %291 {offsets = [0, 96], sizes = [8, 32], strides = [1, 1]} : vector<8x128xf32> to vector<8x32xf32>
    %296 = arith.mulf %293, %279 : vector<8x32xf32>
    %297 = arith.mulf %292, %294 : vector<8x32xf32>
    %298 = arith.addf %296, %297 : vector<8x32xf32>
    %299 = math.tanh %298 : vector<8x32xf32>
    %300 = arith.mulf %295, %299 : vector<8x32xf32>
    %301 = arith.addi %11, %c7_i32 : i32
    %302 = vector.broadcast %301 : i32 to vector<8x1xi32>
    %303 = arith.cmpi slt, %302, %4 : vector<8x1xi32>
    %cst_61 = arith.constant 0.000000e+00 : f32
    %304 = vector.shape_cast %303 : vector<8x1xi1> to vector<8x1xi1>
    %305 = vector.broadcast %304 : vector<8x1xi1> to vector<8x32xi1>
    %306 = vector.broadcast %cst_61 : f32 to vector<8x32xf32>
    %307 = arith.select %305, %300, %306 : vector<8x32xi1>, vector<8x32xf32>
    %308 = arith.index_cast %c7_i32 : i32 to index
    %c0_62 = arith.constant 0 : index
    %c0_63 = arith.constant 0 : index
    %309 = vector.load %arg6[%308, %c0_62, %c0_63] : memref<8x8x32xf32, #tpu.memory_space<vmem>>, vector<1x8x32xf32>
    %310 = vector.shape_cast %309 : vector<1x8x32xf32> to vector<8x32xf32>
    %311 = vector.shape_cast %307 : vector<8x32xf32> to vector<1x8x32xf32>
    tpu.vector_store %arg6[%308, %c0_62, %c0_63], %311 {strides = array<i32>} : memref<8x8x32xf32, #tpu.memory_space<vmem>>, vector<1x8x32xf32>,
    %312 = vector.shape_cast %303 : vector<8x1xi1> to vector<8x1xi1>
    %313 = vector.broadcast %312 : vector<8x1xi1> to vector<8x32xi1>
    %314 = arith.select %313, %300, %276 : vector<8x32xi1>, vector<8x32xf32>
    %315 = vector.shape_cast %303 : vector<8x1xi1> to vector<8x1xi1>
    %316 = vector.broadcast %315 : vector<8x1xi1> to vector<8x32xi1>
    %317 = arith.select %316, %298, %279 : vector<8x32xi1>, vector<8x32xf32>
    %c8_i32_64 = arith.constant 8 : i32
    %c0_65 = arith.constant 0 : index
    %c0_66 = arith.constant 0 : index
    %318 = vector.load %arg7[%c0_65, %c0_66] : memref<8x32xf32, #tpu.memory_space<vmem>>, vector<8x32xf32>
    tpu.vector_store %arg7[%c0_65, %c0_66], %314 {strides = array<i32>} : memref<8x32xf32, #tpu.memory_space<vmem>>, vector<8x32xf32>,
    %c0_67 = arith.constant 0 : index
    %c0_68 = arith.constant 0 : index
    %319 = vector.load %arg8[%c0_67, %c0_68] : memref<8x32xf32, #tpu.memory_space<vmem>>, vector<8x32xf32>
    tpu.vector_store %arg8[%c0_67, %c0_68], %317 {strides = array<i32>} : memref<8x32xf32, #tpu.memory_space<vmem>>, vector<8x32xf32>,
    return
  }
  func.func @transform_0(%arg0: i32) -> (i32, i32) {
    %c0_i32 = arith.constant 0 : i32
    %c0_i32_0 = arith.constant 0 : i32
    %c0_i32_1 = arith.constant 0 : i32
    return %c0_i32, %c0_i32_0 : i32, i32
  }
  func.func @transform_1(%arg0: i32) -> (i32, i32, i32) {
    %c0_i32 = arith.constant 0 : i32
    %c0_i32_0 = arith.constant 0 : i32
    %c0_i32_1 = arith.constant 0 : i32
    return %arg0, %c0_i32, %c0_i32_0 : i32, i32, i32
  }
  func.func @transform_2(%arg0: i32) -> (i32, i32) {
    %c0_i32 = arith.constant 0 : i32
    %c0_i32_0 = arith.constant 0 : i32
    %c0_i32_1 = arith.constant 0 : i32
    return %c0_i32, %c0_i32_0 : i32, i32
  }
  func.func @transform_3(%arg0: i32) -> (i32, i32) {
    %c0_i32 = arith.constant 0 : i32
    %c0_i32_0 = arith.constant 0 : i32
    %c0_i32_1 = arith.constant 0 : i32
    return %c0_i32, %c0_i32_0 : i32, i32
  }
  func.func @transform_4(%arg0: i32) -> (i32, i32) {
    %c0_i32 = arith.constant 0 : i32
    %c0_i32_0 = arith.constant 0 : i32
    %c0_i32_1 = arith.constant 0 : i32
    return %c0_i32, %c0_i32_0 : i32, i32
  }
  func.func @transform_5(%arg0: i32) -> (i32, i32, i32) {
    %c0_i32 = arith.constant 0 : i32
    %c0_i32_0 = arith.constant 0 : i32
    %c0_i32_1 = arith.constant 0 : i32
    return %arg0, %c0_i32, %c0_i32_0 : i32, i32, i32
  }
  func.func @transform_6(%arg0: i32) -> (i32, i32) {
    %c0_i32 = arith.constant 0 : i32
    %c0_i32_0 = arith.constant 0 : i32
    %c0_i32_1 = arith.constant 0 : i32
    return %c0_i32, %c0_i32_0 : i32, i32
  }
  func.func @transform_7(%arg0: i32) -> (i32, i32) {
    %c0_i32 = arith.constant 0 : i32
    %c0_i32_0 = arith.constant 0 : i32
    %c0_i32_1 = arith.constant 0 : i32
    return %c0_i32, %c0_i32_0 : i32, i32
  }
}

</mosaic_0001>

<bundles_post_ra>
// kernel: tpu_custom_call.1
= control target key start
LH: loop header
LB: loop body
LE: loop exit
PB: predicated region body
PF: predicated region fallthrough
CT: control target
= control target key end

     0   :  { %13 = vsyncpa [#allocation3], 0  ;;  %s1366_s0 = inlined_call_operand.vmem [shape: s32[8,1], index: 0, kind: input, shape index: {}]   ;;  %s1367_s1 = inlined_call_operand.hbm [shape: f32[8,8,128], index: 1, kind: input, shape index: {}]   ;;  %s1368_s2 = inlined_call_operand.hbm [shape: f32[32,128], index: 2, kind: input, shape index: {}]   ;;  %s1369_s3 = inlined_call_operand.vmem [shape: f32[8,32], index: 3, kind: input, shape index: {}]   ;;  %s1370_s4 = inlined_call_operand.hbm [shape: f32[8,32], index: 4, kind: input, shape index: {}]   ;;  %s1371_s5 = inlined_call_operand.hbm [shape: f32[8,8,32], index: 5, kind: output, shape index: {0}]   ;;  %s1372_s6 = inlined_call_operand.hbm [shape: f32[8,32], index: 6, kind: output, shape index: {1}]   ;;  %s1373_s7 = inlined_call_operand.hbm [shape: f32[8,32], index: 7, kind: output, shape index: {2}]  }
   0x1   :  { %14 = vsyncpa [#allocation6], 0 }
   0x2   :  { %15 = vsyncpa [#allocation4], 0 }
   0x3   :  { %16 = vsyncpa [#allocation10], 0  ;;  %s36_s26 = sshll.u32 %s1368_s2, 4  ;;  %s1075_s27 = smov [#allocation5]   ;;  %s37_s26 = int_to_ptr.hbm [resolvable:$true] %s36_s26 }
   0x4   :  { %s38_s28 = sshll.u32 %s1075_s27, 4  ;;  %s23_s8 = sshll.u32 %s1367_s1, 4  ;;  %s39_s28 = int_to_ptr.vmem [resolvable:$true] %s38_s28  ;;  %s24_s8 = int_to_ptr.hbm [resolvable:$true] %s23_s8 }
   0x5   :  { %s1076_s9 = smov 128   ;;  %s1077_s10 = smov 8  }
   0x6   :  { %44 = dma.hbm_to_vmem [thread:$0]  %s37_s26, 512, %s39_s28, [#allocation6], %s1076_s9, %s1076_s9, %s1077_s10  }
   0x7   :  { %s1078_s11 = smov [#allocation2]   ;;  %s52_s2 = sshll.u32 %s1370_s4, 4  ;;  %s53_s2 = int_to_ptr.hbm [resolvable:$true] %s52_s2 }
   0x8   :  { %s25_s12 = sshll.u32 %s1078_s11, 4  ;;  %s1079_s1 = smov [#allocation7]   ;;  %s26_s12 = int_to_ptr.vmem [resolvable:$true] %s25_s12 }
   0x9   :  { %31 = dma.hbm_to_vmem [thread:$0]  %s24_s8, 1024, %s26_s12, [#allocation3], %s1076_s9, %s1076_s9, %s1077_s10  }
   0xa   :  { %s54_s15 = sshll.u32 %s1079_s1, 4  ;;  %s55_s15 = int_to_ptr.vmem [resolvable:$true] %s54_s15 }
   0xb   :  { %57 = dma.hbm_to_vmem [thread:$0]  %s53_s2, 128, %s55_s15, [#allocation6]  }
   0xc   :  { %1067 = dma.done.wait [#allocation3], 1024  }
   0xd   :  { %1068 = vsyncadd [#allocation3], 4294966272 }
   0xe   :  { %1069 = dma.done.wait [#allocation6], 640  }
   0xf   :  { %1070 = vsyncadd [#allocation6], 4294966656  ;;  %vm75_vm0 = vcmask 261120   ;;  %v82_v0 = vld [vmem:[#allocation5 + $0x18] sm:$0xff]  ;;  %v81_v1 = vld [vmem:[#allocation5 + $0x10] sm:$0xff]  ;;  %v84_v13 = vlaneseq  ;;  %s1081_s17 = smov 32  }
  0x10   :  { %109 = vmatpush.msra.mxu0 %v82_v0  ;;  %v74_v2 = vld [vmem:[%s1369_s3] sm:$0xff]  ;;  %197 = vmatpush.msra.mxu1 %v82_v0  ;;  %v80_v3 = vld [vmem:[#allocation5 + $0x8] sm:$0xff]  ;;  %s1080_s3 = smov 64   ;;  %v1082_v30 = vmov 0   ;;  %s1083_s20 = smov 96  }
  0x11   :  { %76 = vst.msk [vmem:[#allocation9] sm:$0xff] %vm75_vm0, %v74_v2  ;;  %280 = vmatpush.msra.mxu2 %v82_v0  ;;  %363 = vmatpush.msra.mxu3 %v82_v0  ;;  %v79_v4 = vld [vmem:[#allocation5] sm:$0xff]  ;;  %v85_v15 = vand.u32 127, %v84_v13  ;;  %v179_v45 = vld [vmem:[#allocation2 + $0x8] sm:$0xff]  ;;  %s775_s24 = sshll.u32 %s1371_s5, 4  ;;  %s1085_s25 = smov [#allocation9]   ;;  %s776_s24 = int_to_ptr.hbm [resolvable:$true] %s775_s24 }
  0x12   :  { %110 = vmatpush.msra.mxu0 %v81_v1  ;;  %198 = vmatpush.msra.mxu1 %v81_v1  ;;  %v92_v6 = vld [vmem:[#allocation2] sm:$0xff]  ;;  %s787_s26 = sshll.u32 %s1085_s25, 4  ;;  %s789_s29 = sshll.u32 %s1372_s6, 4  ;;  %s788_s26 = int_to_ptr.vmem [resolvable:$true] %s787_s26  ;;  %s790_s29 = int_to_ptr.hbm [resolvable:$true] %s789_s29 }
  0x13   :  { %281 = vmatpush.msra.mxu2 %v81_v1  ;;  %364 = vmatpush.msra.mxu3 %v81_v1  ;;  %v77_v7 = vld [vmem:[#allocation7] sm:$0xff]  ;;  %vm86_vm1 = vcmp.ge.s32.totalorder %v85_v15, 64  ;;  %vm87_vm2 = vcmp.lt.s32.totalorder %v85_v15, 96  ;;  %s1086_s5 = smov [#allocation11]   ;;  %s800_s12 = sshll.u32 %s1373_s7, 4  ;;  %s801_s12 = int_to_ptr.hbm [resolvable:$true] %s800_s12 }
  0x14   :  { %111 = vmatpush.msra.mxu0 %v80_v3  ;;  %199 = vmatpush.msra.mxu1 %v80_v3  ;;  %78 = vst.msk [vmem:[#allocation11] sm:$0xff] %vm75_vm0, %v77_v7  ;;  %vm1151_vm4 = vmand %vm86_vm1, %vm87_vm2  ;;  %v1162_v29 = vld [vmem:[%s1366_s0] sm:$0xff]  ;;  %s1084_s0 = smov [#allocation8]   ;;  %s798_s30 = sshll.u32 %s1086_s5, 4  ;;  %s799_s30 = int_to_ptr.vmem [resolvable:$true] %s798_s30 }
  0x15   :  { %282 = vmatpush.msra.mxu2 %v80_v3  ;;  %365 = vmatpush.msra.mxu3 %v80_v3  ;;  %vm822_vm8 = vcmp.gt.s32.totalorder %v1162_v29, 0  ;;  %vm825_vm14 = vcmp.gt.s32.totalorder %v1162_v29, 1  ;;  %s773_s21 = sshll.u32 %s1084_s0, 4  ;;  %s774_s21 = int_to_ptr.vmem [resolvable:$true] %s773_s21 }
  0x16   :  { %112 = vmatpush.msra.mxu0 %v79_v4  ;;  %200 = vmatpush.msra.mxu1 %v79_v4  ;;  %v162_v31 = vsel %vm822_vm8, 1, %v1082_v30  ;;  %v247_v63 = vsel %vm825_vm14, 1, %v1082_v30 }
  0x17   :  { %283 = vmatpush.msra.mxu2 %v79_v4  ;;  %366 = vmatpush.msra.mxu3 %v79_v4 }
  0x18   :  { %v1146_v5 = vld [vmem:[#allocation9] sm:$0xff]  ;;  %446 = vmatpush.msrb.mxu0 %v82_v0  ;;  %529 = vmatpush.msrb.mxu1 %v82_v0 }
  0x19   :  { %820 = vmatmul.msk.f32.vlgmr.msra.gmra.mxu0 %vm75_vm0, %v1146_v5  ;;  %612 = vmatpush.msrb.mxu2 %v82_v0 }
  0x1a   :  { %447 = vmatpush.msrb.mxu0 %v81_v1  ;;  %530 = vmatpush.msrb.mxu1 %v81_v1 }
  0x1b   :  { %613 = vmatpush.msrb.mxu2 %v81_v1  ;;  %695 = vmatpush.msrb.mxu3 %v82_v0  ;;  %v91_v28 = vld [vmem:[#allocation11] sm:$0xff] }
  0x1c   :  { %448 = vmatpush.msrb.mxu0 %v80_v3  ;;  %531 = vmatpush.msrb.mxu1 %v80_v3 }
  0x1d   :  { %614 = vmatpush.msrb.mxu2 %v80_v3  ;;  %696 = vmatpush.msrb.mxu3 %v81_v1 }
  0x1e   :  { %449 = vmatpush.msrb.mxu0 %v79_v4  ;;  %532 = vmatpush.msrb.mxu1 %v79_v4 }
  0x1f   :  { %615 = vmatpush.msrb.mxu2 %v79_v4  ;;  %697 = vmatpush.msrb.mxu3 %v80_v3 }
  0x20   :  { %856 = vset.pattern.permute.xlu2 %v1082_v30  ;;  %857 = vset.pattern.permute.xlu1 %v1082_v30 }
  0x21   :  { %698 = vmatpush.msrb.mxu3 %v79_v4  ;;  %858 = vset.pattern.permute.xlu0 %v1082_v30 }
  0x22   :  { %164 = vperm.xlu2 %856, %v162_v31  }
  0x2a   :  { %173 = vrot.lane.b32.xlu2 %v1146_v5, %s1083_s20 }
  0x7c   :  { %v1173_v39 = vpop.permute.xlu2 %164 }
  0x7d   :  { %vm166_vm9 = vcmp.eq.s32.totalorder %v1173_v39, 1 }
  0x84   :  { %v174_v41 = vpop.permute.xlu2 %173 }
  0x96   :  { %v114_v8 = vpop.f32.mrf.mxu0 }
  0x97   :  { %v117_v9 = vadd.f32 %v114_v8, %v92_v6 }
  0x99   :  { %v821_v10 = vmul.f32 -1.442695, %v117_v9 }
  0x9b   :  { %859 = vpow2.f32 %v821_v10 }
  0xa1   :  { %v860_v11 = vpop.eup %859 }
  0xa2   :  { %v122_v12 = vadd.f32 1.0, %v860_v11 }
  0xa4   :  { %861 = vrcp.f32 %v122_v12  ;;  %v134_v18 = vand.u32 2147483648, %v122_v12  ;;  %v132_v20 = vand.u32 2147483647, %v122_v12  ;;  %vm128_vm5 = vweird.f32 %v122_v12 }
  0xa5   :  { %863 = vtanh.f32 %v117_v9 }
  0xa6   :  { %v135_v23 = vor.u32 1.1754944e-38, %v134_v18  ;;  %vm133_vm7 = vcmp.eq.f32.partialorder %v132_v20, 8.507059e+37 }
  0xaa   :  { %v862_v14 = vpop.eup %861 }
  0xab   :  { %v124_v16 = vmul.f32 %v862_v14, %v122_v12  ;;  %vm129_vm3 = vweird.f32 %v862_v14  ;;  %v864_v25 = vpop.eup %863  ;;  %v262_v12 = vld [vmem:[#allocation2 + $0x10] sm:$0xff] }
  0xac   :  { %vm130_vm6 = vmor %vm128_vm5, %vm129_vm3 }
  0xad   :  { %v125_v17 = vsub.f32 1.0, %v124_v16 }
  0xaf   :  { %v126_v19 = vmul.f32 %v862_v14, %v125_v17 }
  0xb1   :  { %v127_v22 = vadd.f32 %v862_v14, %v126_v19 }
  0xb3   :  { %v131_v24 = vsel %vm130_vm6, %v862_v14, %v127_v22  ;;  %vm828_vm6 = vcmp.gt.s32.totalorder %v1162_v29, 2 }
  0xb4   :  { %v136_v26 = vsel %vm133_vm7, %v135_v23, %v131_v24  ;;  %vm831_vm7 = vcmp.gt.s32.totalorder %v1162_v29, 3 }
  0xb5   :  { %v138_v27 = vsel %vm1151_vm4, %v864_v25, %v136_v26 }
  0xb6   :  { %145 = vrot.lane.b32.xlu0 %v138_v27, %s1080_s3 }
  0xbe   :  { %140 = vrot.lane.b32.xlu0 %v91_v28, %s1081_s17 }
 0x128   :  { %v146_v32 = vpop.permute.xlu0 %145 }
 0x129   :  { %v148_v33 = vmul.f32 %v146_v32, %v138_v27 }
 0x12b   :  { %150 = vrot.lane.b32.xlu1 %v148_v33, %s1081_s17  ;;  %v330_v33 = vsel %vm828_vm6, 1, %v1082_v30  ;;  %vm834_vm6 = vcmp.gt.s32.totalorder %v1162_v29, 4 }
 0x130   :  { %v141_v34 = vpop.permute.xlu0 %140 }
 0x131   :  { %v143_v35 = vmul.f32 %v141_v34, %v138_v27 }
 0x19d   :  { %v151_v36 = vpop.permute.xlu1 %150 }
 0x19e   :  { %v153_v37 = vadd.f32 %v151_v36, %v143_v35 }
 0x1a0   :  { %865 = vtanh.f32 %v153_v37  ;;  %v177_v2 = vsel %vm166_vm9, %v153_v37, %v141_v34  ;;  %v413_v34 = vsel %vm831_vm7, 1, %v1082_v30 }
 0x1a6   :  { %v866_v38 = vpop.eup %865 }
 0x1a7   :  { %156 = vrot.lane.b32.xlu1 %v866_v38, %s1080_s3 }
 0x219   :  { %v157_v40 = vpop.permute.xlu1 %156 }
 0x21a   :  { %v1175_v42 = vmul.f32 %v157_v40, %v138_v27 }
 0x21c   :  { %v176_v43 = vsel %vm166_vm9, %v1175_v42, %v174_v41 }
 0x21d   :  { %181 = vrot.lane.b32.xlu0 %v176_v43, %s1081_s17 }
 0x28f   :  { %v182_v44 = vpop.permute.xlu0 %181 }
 0x290   :  { %823 = vmatmul.msk.f32.vlgmr.msra.gmra.mxu1 %vm75_vm0, %v182_v44 }
 0x30d   :  { %v202_v46 = vpop.f32.mrf.mxu1 }
 0x30e   :  { %v205_v47 = vadd.f32 %v202_v46, %v179_v45 }
 0x310   :  { %v824_v48 = vmul.f32 -1.442695, %v205_v47 }
 0x312   :  { %867 = vpow2.f32 %v824_v48 }
 0x318   :  { %v868_v49 = vpop.eup %867 }
 0x319   :  { %v210_v50 = vadd.f32 1.0, %v868_v49  ;;  %v345_v49 = vld [vmem:[#allocation2 + $0x18] sm:$0xff] }
 0x31b   :  { %869 = vrcp.f32 %v210_v50  ;;  %v222_v54 = vand.u32 2147483648, %v210_v50  ;;  %v220_v56 = vand.u32 2147483647, %v210_v50  ;;  %vm216_vm11 = vweird.f32 %v210_v50 }
 0x31c   :  { %871 = vtanh.f32 %v205_v47 }
 0x31d   :  { %v223_v58 = vor.u32 1.1754944e-38, %v222_v54  ;;  %vm221_vm13 = vcmp.eq.f32.partialorder %v220_v56, 8.507059e+37 }
 0x321   :  { %v870_v51 = vpop.eup %869 }
 0x322   :  { %v212_v52 = vmul.f32 %v870_v51, %v210_v50  ;;  %vm217_vm10 = vweird.f32 %v870_v51  ;;  %v872_v60 = vpop.eup %871 }
 0x323   :  { %vm218_vm12 = vmor %vm216_vm11, %vm217_vm10 }
 0x324   :  { %v213_v53 = vsub.f32 1.0, %v212_v52 }
 0x326   :  { %v214_v55 = vmul.f32 %v870_v51, %v213_v53 }
 0x328   :  { %v215_v57 = vadd.f32 %v870_v51, %v214_v55 }
 0x32a   :  { %v219_v59 = vsel %vm218_vm12, %v870_v51, %v215_v57 }
 0x32b   :  { %v224_v61 = vsel %vm221_vm13, %v223_v58, %v219_v59 }
 0x32c   :  { %v226_v62 = vsel %vm1151_vm4, %v872_v60, %v224_v61 }
 0x32d   :  { %229 = vrot.lane.b32.xlu1 %v226_v62, %s1080_s3  ;;  %v227_v3 = vmul.f32 %v226_v62, %v177_v2 }
 0x335   :  { %249 = vperm.xlu1 %857, %v247_v63  }
 0x39f   :  { %v230_v0 = vpop.permute.xlu1 %229 }
 0x3a0   :  { %v232_v1 = vmul.f32 %v230_v0, %v226_v62 }
 0x3a2   :  { %234 = vrot.lane.b32.xlu2 %v232_v1, %s1081_s17 }
 0x3a7   :  { %v1192_v7 = vpop.permute.xlu1 %249 }
 0x3a8   :  { %vm251_vm15 = vcmp.eq.s32.totalorder %v1192_v7, 1 }
 0x3fc   :  { %v235_v4 = vpop.permute.xlu2 %234 }
 0x3fd   :  { %v237_v5 = vadd.f32 %v235_v4, %v227_v3 }
 0x3ff   :  { %873 = vtanh.f32 %v237_v5  ;;  %v260_v37 = vsel %vm251_vm15, %v237_v5, %v177_v2 }
 0x405   :  { %v874_v6 = vpop.eup %873 }
 0x406   :  { %240 = vrot.lane.b32.xlu0 %v874_v6, %s1080_s3 }
 0x478   :  { %v241_v8 = vpop.permute.xlu0 %240 }
 0x479   :  { %v1194_v9 = vmul.f32 %v241_v8, %v226_v62 }
 0x47b   :  { %v259_v10 = vsel %vm251_vm15, %v1194_v9, %v176_v43 }
 0x47c   :  { %264 = vrot.lane.b32.xlu2 %v259_v10, %s1081_s17 }
 0x4d6   :  { %v265_v11 = vpop.permute.xlu2 %264 }
 0x4d7   :  { %826 = vmatmul.msk.f32.vlgmr.msra.gmra.mxu2 %vm75_vm0, %v265_v11 }
 0x55a   :  { %v285_v13 = vpop.f32.mrf.mxu2 }
 0x55b   :  { %v288_v14 = vadd.f32 %v285_v13, %v262_v12 }
 0x55d   :  { %v827_v15 = vmul.f32 -1.442695, %v288_v14 }
 0x55f   :  { %875 = vpow2.f32 %v827_v15 }
 0x565   :  { %v876_v16 = vpop.eup %875 }
 0x566   :  { %v293_v17 = vadd.f32 1.0, %v876_v16 }
 0x568   :  { %877 = vrcp.f32 %v293_v17  ;;  %v305_v22 = vand.u32 2147483648, %v293_v17  ;;  %v303_v24 = vand.u32 2147483647, %v293_v17  ;;  %vm299_vm2 = vweird.f32 %v293_v17 }
 0x569   :  { %879 = vtanh.f32 %v288_v14 }
 0x56a   :  { %v306_v26 = vor.u32 1.1754944e-38, %v305_v22  ;;  %vm304_vm5 = vcmp.eq.f32.partialorder %v303_v24, 8.507059e+37 }
 0x56e   :  { %v878_v18 = vpop.eup %877 }
 0x56f   :  { %v295_v19 = vmul.f32 %v878_v18, %v293_v17  ;;  %vm300_vm1 = vweird.f32 %v878_v18  ;;  %v880_v28 = vpop.eup %879  ;;  %v428_v17 = vld [vmem:[#allocation2 + $0x20] sm:$0xff] }
 0x570   :  { %vm301_vm3 = vmor %vm299_vm2, %vm300_vm1 }
 0x571   :  { %v296_v20 = vsub.f32 1.0, %v295_v19 }
 0x573   :  { %v297_v23 = vmul.f32 %v878_v18, %v296_v20 }
 0x575   :  { %v298_v25 = vadd.f32 %v878_v18, %v297_v23 }
 0x577   :  { %v302_v27 = vsel %vm301_vm3, %v878_v18, %v298_v25 }
 0x578   :  { %v307_v31 = vsel %vm304_vm5, %v306_v26, %v302_v27 }
 0x579   :  { %v309_v32 = vsel %vm1151_vm4, %v880_v28, %v307_v31 }
 0x57a   :  { %312 = vrot.lane.b32.xlu0 %v309_v32, %s1080_s3  ;;  %v310_v38 = vmul.f32 %v309_v32, %v260_v37 }
 0x582   :  { %332 = vperm.xlu0 %858, %v330_v33  }
 0x58a   :  { %415 = vperm.xlu0 %858, %v413_v34  }
 0x5ec   :  { %v313_v35 = vpop.permute.xlu0 %312 }
 0x5ed   :  { %v315_v36 = vmul.f32 %v313_v35, %v309_v32 }
 0x5ef   :  { %317 = vrot.lane.b32.xlu1 %v315_v36, %s1081_s17 }
 0x5f4   :  { %v1213_v44 = vpop.permute.xlu0 %332 }
 0x5f5   :  { %vm334_vm8 = vcmp.eq.s32.totalorder %v1213_v44, 1 }
 0x5fc   :  { %v1230_v12 = vpop.permute.xlu0 %415 }
 0x5fd   :  { %vm417_vm14 = vcmp.eq.s32.totalorder %v1230_v12, 1 }
 0x661   :  { %v318_v40 = vpop.permute.xlu1 %317 }
 0x662   :  { %v320_v41 = vadd.f32 %v318_v40, %v310_v38  ;;  %v496_v38 = vsel %vm834_vm6, 1, %v1082_v30 }
 0x664   :  { %881 = vtanh.f32 %v320_v41  ;;  %v343_v5 = vsel %vm334_vm8, %v320_v41, %v260_v37 }
 0x66a   :  { %v882_v43 = vpop.eup %881 }
 0x66b   :  { %323 = vrot.lane.b32.xlu2 %v882_v43, %s1080_s3 }
 0x6c5   :  { %v324_v45 = vpop.permute.xlu2 %323 }
 0x6c6   :  { %v1215_v46 = vmul.f32 %v324_v45, %v309_v32 }
 0x6c8   :  { %v342_v47 = vsel %vm334_vm8, %v1215_v46, %v259_v10 }
 0x6c9   :  { %347 = vrot.lane.b32.xlu1 %v342_v47, %s1081_s17 }
 0x73b   :  { %v348_v48 = vpop.permute.xlu1 %347 }
 0x73c   :  { %829 = vmatmul.msk.f32.vlgmr.msra.gmra.mxu3 %vm75_vm0, %v348_v48 }
 0x7bf   :  { %v368_v50 = vpop.f32.mrf.mxu3 }
 0x7c0   :  { %v371_v51 = vadd.f32 %v368_v50, %v345_v49 }
 0x7c2   :  { %v830_v52 = vmul.f32 -1.442695, %v371_v51 }
 0x7c4   :  { %883 = vpow2.f32 %v830_v52 }
 0x7ca   :  { %v884_v53 = vpop.eup %883 }
 0x7cb   :  { %v376_v54 = vadd.f32 1.0, %v884_v53 }
 0x7cd   :  { %885 = vrcp.f32 %v376_v54  ;;  %v388_v58 = vand.u32 2147483648, %v376_v54  ;;  %v386_v60 = vand.u32 2147483647, %v376_v54  ;;  %vm382_vm11 = vweird.f32 %v376_v54 }
 0x7ce   :  { %887 = vtanh.f32 %v371_v51 }
 0x7cf   :  { %v389_v62 = vor.u32 1.1754944e-38, %v388_v58  ;;  %vm387_vm13 = vcmp.eq.f32.partialorder %v386_v60, 8.507059e+37 }
 0x7d3   :  { %v886_v55 = vpop.eup %885 }
 0x7d4   :  { %v378_v56 = vmul.f32 %v886_v55, %v376_v54  ;;  %vm383_vm10 = vweird.f32 %v886_v55  ;;  %v888_v0 = vpop.eup %887 }
 0x7d5   :  { %vm384_vm12 = vmor %vm382_vm11, %vm383_vm10 }
 0x7d6   :  { %v379_v57 = vsub.f32 1.0, %v378_v56 }
 0x7d8   :  { %v380_v59 = vmul.f32 %v886_v55, %v379_v57 }
 0x7da   :  { %v381_v61 = vadd.f32 %v886_v55, %v380_v59 }
 0x7dc   :  { %v385_v63 = vsel %vm384_vm12, %v886_v55, %v381_v61  ;;  %v511_v55 = vld [vmem:[#allocation2 + $0x28] sm:$0xff] }
 0x7dd   :  { %v390_v1 = vsel %vm387_vm13, %v389_v62, %v385_v63 }
 0x7de   :  { %v392_v2 = vsel %vm1151_vm4, %v888_v0, %v390_v1 }
 0x7df   :  { %395 = vrot.lane.b32.xlu2 %v392_v2, %s1080_s3  ;;  %v393_v6 = vmul.f32 %v392_v2, %v343_v5 }
 0x839   :  { %v396_v3 = vpop.permute.xlu2 %395 }
 0x83a   :  { %v398_v4 = vmul.f32 %v396_v3, %v392_v2 }
 0x83c   :  { %400 = vrot.lane.b32.xlu1 %v398_v4, %s1081_s17 }
 0x8ae   :  { %v401_v8 = vpop.permute.xlu1 %400 }
 0x8af   :  { %v403_v10 = vadd.f32 %v401_v8, %v393_v6 }
 0x8b1   :  { %889 = vtanh.f32 %v403_v10  ;;  %v426_v43 = vsel %vm417_vm14, %v403_v10, %v343_v5 }
 0x8b7   :  { %v890_v11 = vpop.eup %889 }
 0x8b8   :  { %406 = vrot.lane.b32.xlu2 %v890_v11, %s1080_s3 }
 0x912   :  { %v407_v13 = vpop.permute.xlu2 %406 }
 0x913   :  { %v1232_v14 = vmul.f32 %v407_v13, %v392_v2 }
 0x915   :  { %v425_v15 = vsel %vm417_vm14, %v1232_v14, %v342_v47 }
 0x916   :  { %430 = vrot.lane.b32.xlu1 %v425_v15, %s1081_s17 }
 0x988   :  { %v431_v16 = vpop.permute.xlu1 %430 }
 0x989   :  { %832 = vmatmul.msk.f32.vlgmr.msrb.gmra.mxu0 %vm75_vm0, %v431_v16 }
 0xa06   :  { %v451_v18 = vpop.f32.mrf.mxu0 }
 0xa07   :  { %v454_v19 = vadd.f32 %v451_v18, %v428_v17 }
 0xa09   :  { %v833_v20 = vmul.f32 -1.442695, %v454_v19 }
 0xa0b   :  { %891 = vpow2.f32 %v833_v20 }
 0xa11   :  { %v892_v22 = vpop.eup %891 }
 0xa12   :  { %v459_v23 = vadd.f32 1.0, %v892_v22 }
 0xa14   :  { %893 = vrcp.f32 %v459_v23  ;;  %v471_v27 = vand.u32 2147483648, %v459_v23  ;;  %v469_v31 = vand.u32 2147483647, %v459_v23  ;;  %vm465_vm2 = vweird.f32 %v459_v23 }
 0xa15   :  { %895 = vtanh.f32 %v454_v19 }
 0xa16   :  { %v472_v33 = vor.u32 1.1754944e-38, %v471_v27  ;;  %vm470_vm5 = vcmp.eq.f32.partialorder %v469_v31, 8.507059e+37  ;;  %v594_v27 = vld [vmem:[#allocation2 + $0x30] sm:$0xff] }
 0xa1a   :  { %v894_v24 = vpop.eup %893 }
 0xa1b   :  { %v461_v25 = vmul.f32 %v894_v24, %v459_v23  ;;  %vm466_vm1 = vweird.f32 %v894_v24  ;;  %v896_v35 = vpop.eup %895 }
 0xa1c   :  { %vm467_vm3 = vmor %vm465_vm2, %vm466_vm1  ;;  %vm837_vm1 = vcmp.gt.s32.totalorder %v1162_v29, 5 }
 0xa1d   :  { %v462_v26 = vsub.f32 1.0, %v461_v25  ;;  %v579_v11 = vsel %vm837_vm1, 1, %v1082_v30 }
 0xa1f   :  { %v463_v28 = vmul.f32 %v894_v24, %v462_v26 }
 0xa21   :  { %v464_v32 = vadd.f32 %v894_v24, %v463_v28 }
 0xa23   :  { %v468_v34 = vsel %vm467_vm3, %v894_v24, %v464_v32 }
 0xa24   :  { %v473_v36 = vsel %vm470_vm5, %v472_v33, %v468_v34 }
 0xa25   :  { %v475_v37 = vsel %vm1151_vm4, %v896_v35, %v473_v36 }
 0xa26   :  { %478 = vrot.lane.b32.xlu2 %v475_v37, %s1080_s3  ;;  %v476_v45 = vmul.f32 %v475_v37, %v426_v43 }
 0xa2e   :  { %498 = vperm.xlu2 %856, %v496_v38  }
 0xa80   :  { %v479_v40 = vpop.permute.xlu2 %478 }
 0xa81   :  { %v481_v41 = vmul.f32 %v479_v40, %v475_v37 }
 0xa83   :  { %483 = vrot.lane.b32.xlu0 %v481_v41, %s1081_s17 }
 0xa88   :  { %v1249_v50 = vpop.permute.xlu2 %498 }
 0xa89   :  { %vm500_vm7 = vcmp.eq.s32.totalorder %v1249_v50, 1 }
 0xaf5   :  { %v484_v47 = vpop.permute.xlu0 %483 }
 0xaf6   :  { %v486_v48 = vadd.f32 %v484_v47, %v476_v45 }
 0xaf8   :  { %897 = vtanh.f32 %v486_v48  ;;  %v509_v16 = vsel %vm500_vm7, %v486_v48, %v426_v43 }
 0xafe   :  { %v898_v49 = vpop.eup %897 }
 0xaff   :  { %489 = vrot.lane.b32.xlu1 %v898_v49, %s1080_s3 }
 0xb71   :  { %v490_v51 = vpop.permute.xlu1 %489 }
 0xb72   :  { %v1251_v52 = vmul.f32 %v490_v51, %v475_v37 }
 0xb74   :  { %v508_v53 = vsel %vm500_vm7, %v1251_v52, %v425_v15 }
 0xb75   :  { %513 = vrot.lane.b32.xlu0 %v508_v53, %s1081_s17 }
 0xbe7   :  { %v514_v54 = vpop.permute.xlu0 %513 }
 0xbe8   :  { %835 = vmatmul.msk.f32.vlgmr.msrb.gmra.mxu1 %vm75_vm0, %v514_v54 }
 0xc65   :  { %v534_v56 = vpop.f32.mrf.mxu1 }
 0xc66   :  { %v537_v57 = vadd.f32 %v534_v56, %v511_v55 }
 0xc68   :  { %v836_v58 = vmul.f32 -1.442695, %v537_v57 }
 0xc6a   :  { %899 = vpow2.f32 %v836_v58 }
 0xc70   :  { %v900_v59 = vpop.eup %899 }
 0xc71   :  { %v542_v60 = vadd.f32 1.0, %v900_v59 }
 0xc73   :  { %901 = vrcp.f32 %v542_v60  ;;  %v554_v0 = vand.u32 2147483648, %v542_v60  ;;  %v552_v2 = vand.u32 2147483647, %v542_v60  ;;  %vm548_vm11 = vweird.f32 %v542_v60 }
 0xc74   :  { %903 = vtanh.f32 %v537_v57 }
 0xc75   :  { %v555_v4 = vor.u32 1.1754944e-38, %v554_v0  ;;  %vm553_vm13 = vcmp.eq.f32.partialorder %v552_v2, 8.507059e+37  ;;  %v677_v2 = vld [vmem:[#allocation2 + $0x38] sm:$0xff] }
 0xc79   :  { %v902_v61 = vpop.eup %901 }
 0xc7a   :  { %v544_v62 = vmul.f32 %v902_v61, %v542_v60  ;;  %vm549_vm10 = vweird.f32 %v902_v61  ;;  %v904_v6 = vpop.eup %903 }
 0xc7b   :  { %vm550_vm12 = vmor %vm548_vm11, %vm549_vm10  ;;  %vm840_vm11 = vcmp.gt.s32.totalorder %v1162_v29, 6 }
 0xc7c   :  { %v545_v63 = vsub.f32 1.0, %v544_v62 }
 0xc7e   :  { %v546_v1 = vmul.f32 %v902_v61, %v545_v63 }
 0xc80   :  { %v547_v3 = vadd.f32 %v902_v61, %v546_v1 }
 0xc82   :  { %v551_v5 = vsel %vm550_vm12, %v902_v61, %v547_v3 }
 0xc83   :  { %v556_v8 = vsel %vm553_vm13, %v555_v4, %v551_v5 }
 0xc84   :  { %v558_v10 = vsel %vm1151_vm4, %v904_v6, %v556_v8 }
 0xc85   :  { %561 = vrot.lane.b32.xlu1 %v558_v10, %s1080_s3  ;;  %v559_v17 = vmul.f32 %v558_v10, %v509_v16 }
 0xc8d   :  { %581 = vperm.xlu1 %857, %v579_v11  }
 0xcf7   :  { %v562_v13 = vpop.permute.xlu1 %561 }
 0xcf8   :  { %v564_v15 = vmul.f32 %v562_v13, %v558_v10 }
 0xcfa   :  { %566 = vrot.lane.b32.xlu2 %v564_v15, %s1081_s17 }
 0xcff   :  { %v1268_v22 = vpop.permute.xlu1 %581 }
 0xd00   :  { %vm583_vm2 = vcmp.eq.s32.totalorder %v1268_v22, 1 }
 0xd54   :  { %v567_v18 = vpop.permute.xlu2 %566 }
 0xd55   :  { %v569_v19 = vadd.f32 %v567_v18, %v559_v17 }
 0xd57   :  { %905 = vtanh.f32 %v569_v19  ;;  %v592_v56 = vsel %vm583_vm2, %v569_v19, %v509_v16 }
 0xd5d   :  { %v906_v20 = vpop.eup %905 }
 0xd5e   :  { %572 = vrot.lane.b32.xlu0 %v906_v20, %s1080_s3 }
 0xdd0   :  { %v573_v23 = vpop.permute.xlu0 %572 }
 0xdd1   :  { %v1270_v24 = vmul.f32 %v573_v23, %v558_v10 }
 0xdd3   :  { %v591_v25 = vsel %vm583_vm2, %v1270_v24, %v508_v53  ;;  %v662_v53 = vsel %vm840_vm11, 1, %v1082_v30 }
 0xdd4   :  { %596 = vrot.lane.b32.xlu2 %v591_v25, %s1081_s17 }
 0xe2e   :  { %v597_v26 = vpop.permute.xlu2 %596 }
 0xe2f   :  { %838 = vmatmul.msk.f32.vlgmr.msrb.gmra.mxu2 %vm75_vm0, %v597_v26 }
 0xeb2   :  { %v617_v28 = vpop.f32.mrf.mxu2 }
 0xeb3   :  { %v620_v31 = vadd.f32 %v617_v28, %v594_v27  ;;  %v252_v28 = vsel %vm251_vm15, %v1194_v9, 0.0  ;;  %v584_v9 = vsel %vm583_vm2, %v1270_v24, 0.0  ;;  %v167_v24 = vsel %vm166_vm9, %v1175_v42, 0.0 }
 0xeb5   :  { %v839_v32 = vmul.f32 -1.442695, %v620_v31 }
 0xeb7   :  { %907 = vpow2.f32 %v839_v32 }
 0xebd   :  { %v908_v33 = vpop.eup %907 }
 0xebe   :  { %v625_v34 = vadd.f32 1.0, %v908_v33 }
 0xec0   :  { %909 = vrcp.f32 %v625_v34  ;;  %v637_v38 = vand.u32 2147483648, %v625_v34  ;;  %v635_v41 = vand.u32 2147483647, %v625_v34  ;;  %vm631_vm5 = vweird.f32 %v625_v34 }
 0xec1   :  { %911 = vtanh.f32 %v620_v31  ;;  %v501_v31 = vsel %vm500_vm7, %v1251_v52, 0.0 }
 0xec2   :  { %v638_v45 = vor.u32 1.1754944e-38, %v637_v38  ;;  %vm636_vm10 = vcmp.eq.f32.partialorder %v635_v41, 8.507059e+37 }
 0xec6   :  { %v910_v35 = vpop.eup %909 }
 0xec7   :  { %v627_v36 = vmul.f32 %v910_v35, %v625_v34  ;;  %vm632_vm3 = vweird.f32 %v910_v35  ;;  %v912_v48 = vpop.eup %911 }
 0xec8   :  { %vm633_vm6 = vmor %vm631_vm5, %vm632_vm3 }
 0xec9   :  { %v628_v37 = vsub.f32 1.0, %v627_v36 }
 0xecb   :  { %v629_v40 = vmul.f32 %v910_v35, %v628_v37  ;;  %v418_v37 = vsel %vm417_vm14, %v1232_v14, 0.0 }
 0xecd   :  { %v630_v43 = vadd.f32 %v910_v35, %v629_v40 }
 0xecf   :  { %v634_v47 = vsel %vm633_vm6, %v910_v35, %v630_v43  ;;  %vm843_vm6 = vcmp.gt.s32.totalorder %v1162_v29, 7 }
 0xed0   :  { %v639_v49 = vsel %vm636_vm10, %v638_v45, %v634_v47  ;;  %v745_v27 = vsel %vm843_vm6, 1, %v1082_v30  ;;  %v335_v30 = vsel %vm334_vm8, %v1215_v46, 0.0 }
 0xed1   :  { %v641_v51 = vsel %vm1151_vm4, %v912_v48, %v639_v49 }
 0xed2   :  { %644 = vrot.lane.b32.xlu0 %v641_v51, %s1080_s3  ;;  %v642_v57 = vmul.f32 %v641_v51, %v592_v56 }
 0xeda   :  { %664 = vperm.xlu0 %858, %v662_v53  }
 0xf44   :  { %v645_v54 = vpop.permute.xlu0 %644 }
 0xf45   :  { %v647_v55 = vmul.f32 %v645_v54, %v641_v51 }
 0xf47   :  { %649 = vrot.lane.b32.xlu1 %v647_v55, %s1081_s17 }
 0xf4c   :  { %v1287_v61 = vpop.permute.xlu0 %664 }
 0xf4d   :  { %vm666_vm12 = vcmp.eq.s32.totalorder %v1287_v61, 1 }
 0xfb9   :  { %v650_v58 = vpop.permute.xlu1 %649 }
 0xfba   :  { %v652_v59 = vadd.f32 %v650_v58, %v642_v57 }
 0xfbc   :  { %913 = vtanh.f32 %v652_v59  ;;  %v675_v52 = vsel %vm666_vm12, %v652_v59, %v592_v56 }
 0xfc2   :  { %v914_v60 = vpop.eup %913 }
 0xfc3   :  { %655 = vrot.lane.b32.xlu2 %v914_v60, %s1080_s3 }
0x101d   :  { %v656_v62 = vpop.permute.xlu2 %655 }
0x101e   :  { %v1289_v63 = vmul.f32 %v656_v62, %v641_v51 }
0x1020   :  { %v1295_v0 = vsel %vm666_vm12, %v1289_v63, %v591_v25  ;;  %v667_v38 = vsel %vm666_vm12, %v1289_v63, 0.0 }
0x1021   :  { %679 = vrot.lane.b32.xlu1 %v1295_v0, %s1081_s17 }
0x1093   :  { %v680_v1 = vpop.permute.xlu1 %679 }
0x1094   :  { %841 = vmatmul.msk.f32.vlgmr.msrb.gmra.mxu3 %vm75_vm0, %v680_v1 }
0x1117   :  { %v700_v3 = vpop.f32.mrf.mxu3 }
0x1118   :  { %v703_v4 = vadd.f32 %v700_v3, %v677_v2 }
0x111a   :  { %v842_v5 = vmul.f32 -1.442695, %v703_v4 }
0x111c   :  { %915 = vpow2.f32 %v842_v5 }
0x1122   :  { %v916_v6 = vpop.eup %915 }
0x1123   :  { %v708_v8 = vadd.f32 1.0, %v916_v6 }
0x1125   :  { %917 = vrcp.f32 %v708_v8  ;;  %v720_v15 = vand.u32 2147483648, %v708_v8  ;;  %v718_v17 = vand.u32 2147483647, %v708_v8  ;;  %vm714_vm1 = vweird.f32 %v708_v8 }
0x1126   :  { %919 = vtanh.f32 %v703_v4 }
0x1127   :  { %v721_v19 = vor.u32 1.1754944e-38, %v720_v15  ;;  %vm719_vm5 = vcmp.eq.f32.partialorder %v718_v17, 8.507059e+37 }
0x112b   :  { %v918_v10 = vpop.eup %917 }
0x112c   :  { %v710_v11 = vmul.f32 %v918_v10, %v708_v8  ;;  %vm715_vm13 = vweird.f32 %v918_v10  ;;  %v920_v23 = vpop.eup %919 }
0x112d   :  { %vm716_vm3 = vmor %vm714_vm1, %vm715_vm13 }
0x112e   :  { %v711_v13 = vsub.f32 1.0, %v710_v11 }
0x1130   :  { %v712_v16 = vmul.f32 %v918_v10, %v711_v13 }
0x1132   :  { %v713_v18 = vadd.f32 %v918_v10, %v712_v16 }
0x1134   :  { %v717_v20 = vsel %vm716_vm3, %v918_v10, %v713_v18 }
0x1135   :  { %v722_v25 = vsel %vm719_vm5, %v721_v19, %v717_v20 }
0x1136   :  { %v724_v26 = vsel %vm1151_vm4, %v920_v23, %v722_v25 }
0x1137   :  { %727 = vrot.lane.b32.xlu2 %v724_v26, %s1080_s3  ;;  %v725_v33 = vmul.f32 %v724_v26, %v675_v52 }
0x113f   :  { %747 = vperm.xlu2 %856, %v745_v27  }
0x1147   :  { %254 = vrot.lane.b32.xlu2 %v252_v28, %s1081_s17 }
0x114f   :  { %503 = vrot.lane.b32.xlu2 %v501_v31, %s1081_s17 }
0x1191   :  { %v728_v21 = vpop.permute.xlu2 %727 }
0x1192   :  { %v730_v32 = vmul.f32 %v728_v21, %v724_v26 }
0x1194   :  { %732 = vrot.lane.b32.xlu0 %v730_v32, %s1081_s17 }
0x1199   :  { %v748_v29 = vpop.permute.xlu2 %747 }
0x119a   :  { %vm749_vm4 = vcmp.eq.s32.totalorder %v748_v29, 1 }
0x119c   :  { %337 = vrot.lane.b32.xlu0 %v335_v30, %s1081_s17 }
0x11a1   :  { %v255_v7 = vpop.permute.xlu2 %254 }
0x11a2   :  { %258 = vst.msk [vmem:[#allocation8 + $0x8] sm:$0xff] %vm75_vm0, %v255_v7 }
0x11a4   :  { %586 = vrot.lane.b32.xlu0 %v584_v9, %s1081_s17 }
0x11a9   :  { %v504_v50 = vpop.permute.xlu2 %503 }
0x11aa   :  { %507 = vst.msk [vmem:[#allocation8 + $0x20] sm:$0xff] %vm75_vm0, %v504_v50 }
0x1206   :  { %v733_v44 = vpop.permute.xlu0 %732 }
0x1207   :  { %v735_v46 = vadd.f32 %v733_v44, %v725_v33 }
0x1209   :  { %921 = vtanh.f32 %v735_v46  ;;  %v758_v34 = vsel %vm749_vm4, %v735_v46, %v675_v52 }
0x120e   :  { %v338_v35 = vpop.permute.xlu0 %337 }
0x120f   :  { %v922_v36 = vpop.eup %921  ;;  %341 = vst.msk [vmem:[#allocation8 + $0x10] sm:$0xff] %vm75_vm0, %v338_v35 }
0x1210   :  { %738 = vrot.lane.b32.xlu1 %v922_v36, %s1080_s3 }
0x1216   :  { %v587_v22 = vpop.permute.xlu0 %586 }
0x1217   :  { %590 = vst.msk [vmem:[#allocation8 + $0x28] sm:$0xff] %vm75_vm0, %v587_v22 }
0x1218   :  { %169 = vrot.lane.b32.xlu1 %v167_v24, %s1081_s17 }
0x1220   :  { %420 = vrot.lane.b32.xlu1 %v418_v37, %s1081_s17 }
0x1228   :  { %669 = vrot.lane.b32.xlu1 %v667_v38, %s1081_s17 }
0x1282   :  { %v739_v40 = vpop.permute.xlu1 %738 }
0x1283   :  { %v741_v41 = vmul.f32 %v739_v40, %v724_v26 }
0x1285   :  { %v757_v39 = vsel %vm749_vm4, %v741_v41, %v1295_v0  ;;  %v750_v42 = vsel %vm749_vm4, %v741_v41, 0.0 }
0x1286   :  { %760 = vrot.lane.b32.xlu0 %v757_v39, %s1081_s17  ;;  %752 = vrot.lane.b32.xlu2 %v750_v42, %s1081_s17 }
0x128a   :  { %v170_v12 = vpop.permute.xlu1 %169 }
0x128b   :  { %172 = vst.msk [vmem:[#allocation8] sm:$0xff] %vm75_vm0, %v170_v12 }
0x128e   :  { %765 = vrot.lane.b32.xlu0 %v758_v34, %s1083_s20 }
0x1292   :  { %v421_v14 = vpop.permute.xlu1 %420 }
0x1293   :  { %424 = vst.msk [vmem:[#allocation8 + $0x18] sm:$0xff] %vm75_vm0, %v421_v14 }
0x129a   :  { %v670_v43 = vpop.permute.xlu1 %669 }
0x129b   :  { %673 = vst.msk [vmem:[#allocation8 + $0x30] sm:$0xff] %vm75_vm0, %v670_v43 }
0x12e0   :  { %v753_v45 = vpop.permute.xlu2 %752 }
0x12e1   :  { %756 = vst.msk [vmem:[#allocation8 + $0x38] sm:$0xff] %vm75_vm0, %v753_v45 }
0x12e2   :  { %781 = dma.vmem_to_hbm [thread:$0]  %s774_s21, 1024, %s776_s24, [#allocation4], %s1076_s9, %s1076_s9, %s1077_s10  }
0x12f8   :  { %v761_v47 = vpop.permute.xlu0 %760 }
0x12f9   :  { %763 = vst.msk [vmem:[#allocation9] sm:$0xff] %vm75_vm0, %v761_v47 }
0x12fa   :  { %792 = dma.vmem_to_hbm [thread:$0]  %s788_s26, 128, %s790_s29, [#allocation10]  }
0x1300   :  { %v766_v48 = vpop.permute.xlu0 %765 }
0x1301   :  { %768 = vst.msk [vmem:[#allocation11] sm:$0xff] %vm75_vm0, %v766_v48 }
0x1302   :  { %803 = dma.vmem_to_hbm [thread:$0]  %s799_s30, 128, %s801_s12, [#allocation10]  }
0x1303   :  { %1071 = dma.done.wait [#allocation4], 1024  }
0x1304   :  { %1072 = vsyncadd [#allocation4], 4294966272 }
0x1305   :  { %1073 = dma.done.wait [#allocation10], 256  }
0x1306   :  { %1074 = vsyncadd [#allocation10], 4294967040 }
0x1307   :  { %816 = vsyncpa [#allocation3], 1 }
0x1308   :  { %817 = vsyncpa [#allocation6], 1 }
0x1309   :  { %818 = vsyncpa [#allocation4], 1 }
0x130a   :  { %819 = vsyncpa [#allocation10], 1 }

</bundles_post_ra>
